<compile_context>
chip_gen: v6e
topology: v6e:2x2x1
jax: 0.10.0
libtpu: 0.0.40
codegen_flags: <defaults>
</compile_context>

<pallas_src>
import functools

import jax
import jax.numpy as jnp
from jax.experimental import pallas as pl
from jax.experimental.pallas import tpu as pltpu

BN_EPS = 1e-5

MOSAIC_PARAMS = pltpu.CompilerParams(
    dimension_semantics=("parallel",),
    vmem_limit_bytes=32 * 1024 * 1024,
)


# ---------------------------------------------------------------------------
# small helpers
# ---------------------------------------------------------------------------
def _round_up(x, m):
    return (x + m - 1) // m * m


def _tile_m(m, cap=4096):
    """Row-tile size for the (M, C) matmul kernels.

    Large tiles amortize per-grid-step overhead; once the problem is big
    enough the tile is sized so the grid has >= 2 steps (v7x megacore can
    then shard the "parallel" axis across its 2 TensorCores).
    """
    if m <= 512:
        return max(16, _round_up(m, 16))
    return min(cap, _round_up((m + 1) // 2, 128))


def _pad_rows(x, mp):
    m = x.shape[0]
    if mp == m:
        return x
    return jnp.pad(x, ((0, mp - m), (0, 0)))


def _bn_fold(stats, gamma, beta, m, tm):
    """Fold per-tile centered batch statistics into per-channel (scale, shift).

    stats: (grid_m, 2, C) per-tile [row-sum, centered sum-of-squares].
    Combined with the parallel (Chan et al.) variance formula; biased batch
    variance as in PyTorch BatchNorm training mode.
    """
    gm = stats.shape[0]
    counts = jnp.minimum(tm, m - jnp.arange(gm, dtype=jnp.int32) * tm)
    counts = counts.astype(jnp.float32)[:, None]            # (gm, 1)
    s_t = stats[:, 0, :]                                     # (gm, C)
    m2_t = stats[:, 1, :]                                    # (gm, C)
    mean = jnp.sum(s_t, axis=0) / m                          # (C,)
    mu_t = s_t / counts
    m2 = jnp.sum(m2_t + counts * (mu_t - mean[None, :]) ** 2, axis=0)
    var = m2 / m
    scale = gamma * jax.lax.rsqrt(var + BN_EPS)
    shift = beta - mean * scale
    c = gamma.shape[0]
    return (scale.reshape(1, c).astype(jnp.float32),
            shift.reshape(1, c).astype(jnp.float32))


def _tile_centered_stats(y, m_valid, tm):
    """In-kernel per-tile [row-sum, centered sum-of-squares] of y (tm, C).

    Zero-padded rows (beyond m_valid) contribute nothing: they are zero by
    construction for the sum and are masked out of the centered squares.
    """
    pid = pl.program_id(0)
    n_t = jnp.minimum(tm, m_valid - pid * tm)
    s = jnp.sum(y, axis=0, keepdims=True)                    # (1, C)
    mu = s / n_t.astype(jnp.float32)
    if m_valid % tm != 0:
        rows = jax.lax.broadcasted_iota(jnp.int32, y.shape, 0)
        d = jnp.where(rows < n_t, y - mu, 0.0)
    else:
        d = y - mu
    m2 = jnp.sum(d * d, axis=0, keepdims=True)               # (1, C)
    return jnp.concatenate([s, m2], axis=0)                  # (2, C)


# ---------------------------------------------------------------------------
# Pallas kernels
# ---------------------------------------------------------------------------
def _matmul_stats_kernel(*refs, n_pairs, m_valid, tm):
    """Stats-only pass: y = sum_t P_t @ W_t ; emit per-tile centered stats."""
    stats_ref = refs[-1]
    y = None
    for t in range(n_pairs):
        d = jnp.dot(refs[2 * t][...], refs[2 * t + 1][...],
                    preferred_element_type=jnp.float32)
        y = d if y is None else y + d
    stats_ref[...] = _tile_centered_stats(y, m_valid, tm)[None]


def _matmul_emit_stats_kernel(*refs, n_pairs, m_valid, tm):
    """Single-read pass 1: y = sum_t P_t @ W_t ; write y (bf16) + stats."""
    y_ref, stats_ref = refs[-2], refs[-1]
    y = None
    for t in range(n_pairs):
        d = jnp.dot(refs[2 * t][...], refs[2 * t + 1][...],
                    preferred_element_type=jnp.float32)
        y = d if y is None else y + d
    y_ref[...] = y.astype(y_ref.dtype)
    stats_ref[...] = _tile_centered_stats(y, m_valid, tm)[None]


def _stem1_pass2_kernel(p_ref, w1_ref, scale1_ref, shift1_ref, w2_ref,
                        s1_ref, y2_ref, stats2_ref, *, m_valid, tm):
    """stem1 pass 2 (BN+ReLU) fused with the stem2a 1x1 matmul and its stats."""
    y1 = jnp.dot(p_ref[...], w1_ref[...], preferred_element_type=jnp.float32)
    s1 = jnp.maximum(y1 * scale1_ref[...] + shift1_ref[...], 0.0)
    if m_valid % tm != 0:
        # keep zero-padded rows out of the stem2a output/statistics
        rows = (jax.lax.broadcasted_iota(jnp.int32, s1.shape, 0)
                + pl.program_id(0) * tm)
        s1 = jnp.where(rows < m_valid, s1, 0.0)
    s1_ref[...] = s1.astype(s1_ref.dtype)
    y2 = jnp.dot(s1.astype(jnp.bfloat16), w2_ref[...],
                 preferred_element_type=jnp.float32)
    y2_ref[...] = y2.astype(y2_ref.dtype)
    stats2_ref[...] = _tile_centered_stats(y2, m_valid, tm)[None]


def _bn_relu_kernel(y_ref, scale_ref, shift_ref, o_ref, *, relu):
    """Lane-dense BN (+optional ReLU) elementwise pass."""
    o = y_ref[...].astype(jnp.float32) * scale_ref[...] + shift_ref[...]
    if relu:
        o = jnp.maximum(o, 0.0)
    o_ref[...] = o.astype(o_ref.dtype)


def _maxpool_kernel(x_ref, o_ref, *, c):
    """2x2/s2 max pool; x_ref is (2*TR, Wp, 2*C), o_ref is (TR, Wp, C)."""
    x = x_ref[...]
    r2 = x.shape[0]
    x = x.reshape(r2 // 2, 2, x.shape[1], x.shape[2])
    h = jnp.maximum(x[:, 0], x[:, 1])                    # pool over H pairs
    o_ref[...] = jnp.maximum(h[:, :, :c], h[:, :, c:])   # pool over W pairs


# ---------------------------------------------------------------------------
# Pallas wrappers
# ---------------------------------------------------------------------------
def bn_relu_apply(y, scale, shift, m, tm, gm, cout, out_dtype, relu=True):
    """BN(+ReLU) on the conv output y (mp, cout) via a lane-dense flat view.

    y is reinterpreted (free row-major reshape) as (mp/fold, fold*cout) with
    fold*cout a multiple of 128, so stores are full-lane, and scale/shift are
    tiled fold-times along lanes.
    """
    mp = y.shape[0]
    fold = 1
    for f in (8, 4, 2):
        if (f * cout) % 128 == 0 and tm % f == 0:
            fold = f
            break
    rows, trr = mp // fold, tm // fold
    yv = y.reshape(rows, fold * cout)
    sc = jnp.tile(scale, (1, fold))
    sh = jnp.tile(shift, (1, fold))
    out = pl.pallas_call(
        functools.partial(_bn_relu_kernel, relu=relu),
        out_shape=jax.ShapeDtypeStruct((rows, fold * cout), out_dtype),
        grid=(gm,),
        in_specs=[pl.BlockSpec((trr, fold * cout), lambda i: (i, 0)),
                  pl.BlockSpec((1, fold * cout), lambda i: (0, 0)),
                  pl.BlockSpec((1, fold * cout), lambda i: (0, 0))],
        out_specs=pl.BlockSpec((trr, fold * cout), lambda i: (i, 0)),
        compiler_params=MOSAIC_PARAMS,
    )(yv, sc, sh)
    return out.reshape(mp, cout)[:m]


def conv_bn_relu_single_read(pairs, gamma, beta, m, *, relu=True,
                             out_dtype=jnp.float32):
    """conv(-as-matmul) + training-mode BatchNorm + optional ReLU, single-read.

    pairs: list of (patches (m, K_t), weight (K_t, Cout)); the per-pair
    matmuls are summed (len > 1 replaces a channel concat).  Pass 1 does the
    matmul once, writes y (bf16) and per-tile centered statistics; pass 2 is
    a BN+ReLU-only elementwise kernel over a lane-dense view of y.
    """
    cout = pairs[0][1].shape[1]
    tm = _tile_m(m)
    mp = _round_up(m, tm)
    gm = mp // tm

    args, in_specs = [], []
    for p, w in pairs:
        p = _pad_rows(p.astype(jnp.bfloat16), mp)
        w = w.astype(jnp.bfloat16)
        k = p.shape[1]
        args += [p, w]
        in_specs += [pl.BlockSpec((tm, k), lambda i: (i, 0)),
                     pl.BlockSpec((k, cout), lambda i: (0, 0))]

    y, stats = pl.pallas_call(
        functools.partial(_matmul_emit_stats_kernel, n_pairs=len(pairs),
                          m_valid=m, tm=tm),
        out_shape=(jax.ShapeDtypeStruct((mp, cout), jnp.bfloat16),
                   jax.ShapeDtypeStruct((gm, 2, cout), jnp.float32)),
        grid=(gm,),
        in_specs=in_specs,
        out_specs=(pl.BlockSpec((tm, cout), lambda i: (i, 0)),
                   pl.BlockSpec((1, 2, cout), lambda i: (i, 0, 0))),
        compiler_params=MOSAIC_PARAMS,
    )(*args)
    scale, shift = _bn_fold(stats, gamma, beta, m, tm)
    return bn_relu_apply(y, scale, shift, m, tm, gm, cout, out_dtype, relu=relu)


def stem1_with_fused_stem2a(patches1, w1_mat, gamma1, beta1,
                            w2a_mat, gamma2a, beta2a, m):
    """stem1 (3x3/s2 conv+BN+ReLU) with stem2a's 1x1 matmul fused into pass 2."""
    k1, c1 = w1_mat.shape
    c2a = w2a_mat.shape[1]
    tm = _tile_m(m)
    mp = _round_up(m, tm)
    gm = mp // tm

    p1 = _pad_rows(patches1.astype(jnp.bfloat16), mp)
    w1_b16 = w1_mat.astype(jnp.bfloat16)
    w2a_b16 = w2a_mat.astype(jnp.bfloat16)

    # pass 1: batch statistics of the stem1 conv output
    stats1 = pl.pallas_call(
        functools.partial(_matmul_stats_kernel, n_pairs=1, m_valid=m, tm=tm),
        out_shape=jax.ShapeDtypeStruct((gm, 2, c1), jnp.float32),
        grid=(gm,),
        in_specs=[pl.BlockSpec((tm, k1), lambda i: (i, 0)),
                  pl.BlockSpec((k1, c1), lambda i: (0, 0))],
        out_specs=pl.BlockSpec((1, 2, c1), lambda i: (i, 0, 0)),
        compiler_params=MOSAIC_PARAMS,
    )(p1, w1_b16)
    scale1, shift1 = _bn_fold(stats1, gamma1, beta1, m, tm)

    # pass 2: stem1 BN+ReLU, fused stem2a matmul (y2a stored bf16) + stats
    s1, y2a, stats2a = pl.pallas_call(
        functools.partial(_stem1_pass2_kernel, m_valid=m, tm=tm),
        out_shape=(jax.ShapeDtypeStruct((mp, c1), jnp.bfloat16),
                   jax.ShapeDtypeStruct((mp, c2a), jnp.bfloat16),
                   jax.ShapeDtypeStruct((gm, 2, c2a), jnp.float32)),
        grid=(gm,),
        in_specs=[pl.BlockSpec((tm, k1), lambda i: (i, 0)),
                  pl.BlockSpec((k1, c1), lambda i: (0, 0)),
                  pl.BlockSpec((1, c1), lambda i: (0, 0)),
                  pl.BlockSpec((1, c1), lambda i: (0, 0)),
                  pl.BlockSpec((c1, c2a), lambda i: (0, 0))],
        out_specs=(pl.BlockSpec((tm, c1), lambda i: (i, 0)),
                   pl.BlockSpec((tm, c2a), lambda i: (i, 0)),
                   pl.BlockSpec((1, 2, c2a), lambda i: (i, 0, 0))),
        compiler_params=MOSAIC_PARAMS,
    )(p1, w1_b16, scale1, shift1, w2a_b16)
    scale2a, shift2a = _bn_fold(stats2a, gamma2a, beta2a, m, tm)

    # stem2a pass 2: lane-dense normalize + ReLU (matmul already fused above)
    s2a = bn_relu_apply(y2a, scale2a, shift2a, m, tm, gm, c2a, jnp.bfloat16)
    return s1[:m], s2a


def maxpool2x2(x_nhwc):
    """MaxPool2d(kernel_size=2, stride=2) on NHWC, pooled in-kernel.

    The stem's spatial dims are always even here, so ceil_mode=True has no
    effect (same restriction as the reference implementation of this stem).
    Row tiling uses pad-and-mask (no divisor search), ~4 MiB input blocks.
    """
    n, ho, wo, c = x_nhwc.shape
    assert ho % 2 == 0 and wo % 2 == 0
    hp, wp = ho // 2, wo // 2
    nr = n * hp
    x3 = x_nhwc.reshape(n * ho, wp, 2 * c)  # free view: (rows, Wp, [w-pair, C])

    row_bytes = 2 * wp * 2 * c * x3.dtype.itemsize      # input bytes / out row
    cap = max(8, min(2048, (4 << 20) // max(1, row_bytes)))
    if nr <= cap:
        tr = nr
    else:
        tr = min(cap, _round_up((nr + 1) // 2, 8))       # >=2 tiles when large
    nrp = _round_up(nr, tr)
    if nrp != nr:
        x3 = jnp.pad(x3, ((0, 2 * (nrp - nr)), (0, 0), (0, 0)))

    out = pl.pallas_call(
        functools.partial(_maxpool_kernel, c=c),
        out_shape=jax.ShapeDtypeStruct((nrp, wp, c), x_nhwc.dtype),
        grid=(nrp // tr,),
        in_specs=[pl.BlockSpec((2 * tr, wp, 2 * c), lambda r: (r, 0, 0))],
        out_specs=pl.BlockSpec((tr, wp, c), lambda r: (r, 0, 0)),
        compiler_params=MOSAIC_PARAMS,
    )(x3)
    return out[:nr].reshape(n, hp, wp, c)


# ---------------------------------------------------------------------------
# Glue: im2col + weight layout conversion (plain JAX)
# ---------------------------------------------------------------------------
def im2col_3x3_s2_p1(x):
    """x: (N, H, W, C) -> patches (N*Ho*Wo, 9*C), taps ordered (kh, kw, cin)."""
    # TODO(synk): replace this HBM-materialized im2col with in-kernel halo-DMA
    # patch formation so the 3x3-conv patch tensor never round-trips HBM.
    n, h, w, c = x.shape
    xp = jnp.pad(x, ((0, 0), (1, 1), (1, 1), (0, 0)))
    ho = (h + 2 - 3) // 2 + 1
    wo = (w + 2 - 3) // 2 + 1
    cols = []
    for di in range(3):
        for dj in range(3):
            cols.append(xp[:, di:di + 2 * ho - 1:2, dj:dj + 2 * wo - 1:2, :])
    patches = jnp.concatenate(cols, axis=-1)        # (N, Ho, Wo, 9*C)
    return patches.reshape(n * ho * wo, 9 * c), (n, ho, wo)


def conv_weight_to_matmul(w):
    """PyTorch conv weight (Cout, Cin, kh, kw) -> (kh*kw*Cin, Cout)."""
    cout, cin, kh, kw = w.shape
    return jnp.transpose(w, (2, 3, 1, 0)).reshape(kh * kw * cin, cout)


# ---------------------------------------------------------------------------
# StemBlock parameters + forward
# ---------------------------------------------------------------------------
def init_stem_params(key, num_input_channels, num_init_features):
    num_stem = num_init_features // 2
    k1, k2a, k2b, k3 = jax.random.split(key, 4)

    def conv_w(k, cout, cin, ksz):
        fan_in = cin * ksz * ksz
        return jax.random.normal(k, (cout, cin, ksz, ksz), jnp.float32) * (1.0 / jnp.sqrt(fan_in))

    def bn(c):
        # nn.BatchNorm2d defaults: weight=1, bias=0
        return jnp.ones((c,), jnp.float32), jnp.zeros((c,), jnp.float32)

    p = {}
    p["w1"] = conv_w(k1, num_init_features, num_input_channels, 3)
    p["g1"], p["b1"] = bn(num_init_features)
    p["w2a"] = conv_w(k2a, num_stem, num_init_features, 1)
    p["g2a"], p["b2a"] = bn(num_stem)
    p["w2b"] = conv_w(k2b, num_init_features, num_stem, 3)
    p["g2b"], p["b2b"] = bn(num_init_features)
    p["w3"] = conv_w(k3, num_init_features, 2 * num_init_features, 1)
    p["g3"], p["b3"] = bn(num_init_features)
    return p


def stem_block_forward(x_nchw, params):
    x = jnp.transpose(x_nchw, (0, 2, 3, 1)).astype(jnp.bfloat16)  # NCHW -> NHWC

    c1 = params["w1"].shape[0]
    c2a = params["w2a"].shape[0]
    c3 = params["w3"].shape[0]

    # stem1: conv3x3/s2 + BN + ReLU, with stem2a (1x1 conv) fused into pass 2
    p1, (n, ho, wo) = im2col_3x3_s2_p1(x)
    m1 = n * ho * wo
    s1_flat, s2a_flat = stem1_with_fused_stem2a(
        p1, conv_weight_to_matmul(params["w1"]), params["g1"], params["b1"],
        conv_weight_to_matmul(params["w2a"]), params["g2a"], params["b2a"], m1)
    s1 = s1_flat.reshape(n, ho, wo, c1)
    s2a = s2a_flat.reshape(n, ho, wo, c2a)

    # stem2b: conv3x3/s2 + BN + ReLU on the stem2a output (single-read scheme)
    p2b, (_, ho2, wo2) = im2col_3x3_s2_p1(s2a)
    m2 = n * ho2 * wo2
    b2 = conv_bn_relu_single_read(
        [(p2b, conv_weight_to_matmul(params["w2b"]))],
        params["g2b"], params["b2b"], m2, out_dtype=jnp.bfloat16)

    # branch1: 2x2/s2 max pool of the stem1 output
    b1 = maxpool2x2(s1).reshape(m2, c1)

    # stem3: 1x1 conv on concat([b1, b2]) + BN + ReLU — concat eliminated by
    # splitting W3 along its input-channel dimension.
    w3 = conv_weight_to_matmul(params["w3"])          # (2*c1, c3)
    out3 = conv_bn_relu_single_read(
        [(b1, w3[:c1]), (b2, w3[c1:])],
        params["g3"], params["b3"], m2, out_dtype=jnp.float32)
    out3 = out3.reshape(n, ho2, wo2, c3)
    return jnp.transpose(out3, (0, 3, 1, 2))          # NHWC -> NCHW


if __name__ == "__main__":
    key = jax.random.PRNGKey(0)
    kx, kp = jax.random.split(key)

    N, Cin, H, W = 2, 4, 16, 16
    num_init_features = 32

    x = jax.random.normal(kx, (N, Cin, H, W), dtype=jnp.float32)
    params = init_stem_params(kp, Cin, num_init_features)

    out = jax.jit(stem_block_forward)(x, params)
    out = jax.block_until_ready(out)

    assert out.shape == (N, num_init_features, H // 4, W // 4), out.shape
    assert bool(jnp.all(jnp.isfinite(out)))
    print("KERNEL_OK")
</pallas_src>

<mosaic_0001>
module attributes {stable_mosaic.version = 11 : i64} {
  func.func @_matmul_stats_kernel(%arg0: i32, %arg1: memref<128x36xbf16, #tpu.memory_space<vmem>>, %arg2: memref<36x32xbf16, #tpu.memory_space<vmem>>, %arg3: memref<1x2x32xf32, #tpu.memory_space<vmem>>) attributes {dimension_semantics = [#tpu.dimension_semantics<parallel>], iteration_bounds = array<i64: 1>, scalar_prefetch = 0 : i64, scratch_operands = 0 : i64, tpu.core_type = #tpu.core_type<tc>, window_params = [{transform_indices = @transform_0, window_bounds = array<i64: 128, 36>}, {pipeline_mode = #tpu.pipeline_mode<synchronous>, transform_indices = @transform_1, window_bounds = array<i64: 36, 32>}, {transform_indices = @transform_2, window_bounds = array<i64: 1, 2, 32>}]} {
    %c0 = arith.constant 0 : index
    %c0_0 = arith.constant 0 : index
    %0 = vector.load %arg1[%c0, %c0_0] : memref<128x36xbf16, #tpu.memory_space<vmem>>, vector<128x36xbf16>
    %c0_1 = arith.constant 0 : index
    %c0_2 = arith.constant 0 : index
    %1 = vector.load %arg2[%c0_1, %c0_2] : memref<36x32xbf16, #tpu.memory_space<vmem>>, vector<36x32xbf16>
    %cst = arith.constant dense<0.000000e+00> : vector<128x32xf32>
    %2 = tpu.matmul %0, %1, %cst {dimension_numbers = #tpu.dot_dimension_numbers<[1], [0], [0], [1], [0, 0, 1, 1], [], []>} : vector<128x36xbf16>, vector<36x32xbf16>, vector<128x32xf32> -> vector<128x32xf32>
    %c128_i32 = arith.constant 128 : i32
    %3 = arith.muli %arg0, %c128_i32 : i32
    %c128_i32_3 = arith.constant 128 : i32
    %4 = arith.subi %c128_i32_3, %3 : i32
    %c128_i32_4 = arith.constant 128 : i32
    %5 = arith.minsi %c128_i32_4, %4 : i32
    %cst_5 = arith.constant dense<0.000000e+00> : vector<32xf32>
    %6 = vector.multi_reduction <add>, %2, %cst_5 [0] : vector<128x32xf32> to vector<32xf32>
    %7 = vector.shape_cast %6 : vector<32xf32> to vector<1x32xf32>
    %8 = arith.sitofp %5 : i32 to f32
    %9 = vector.broadcast %8 : f32 to vector<1x32xf32>
    %10 = arith.divf %7, %9 : vector<1x32xf32>
    %11 = vector.broadcast %10 : vector<1x32xf32> to vector<128x32xf32>
    %12 = arith.subf %2, %11 : vector<128x32xf32>
    %13 = arith.mulf %12, %12 : vector<128x32xf32>
    %cst_6 = arith.constant dense<0.000000e+00> : vector<32xf32>
    %14 = vector.multi_reduction <add>, %13, %cst_6 [0] : vector<128x32xf32> to vector<32xf32>
    %15 = vector.shape_cast %14 : vector<32xf32> to vector<1x32xf32>
    %16 = tpu.concatenate %7, %15 in 0 : vector<1x32xf32>, vector<1x32xf32> -> vector<2x32xf32>
    %17 = vector.shape_cast %16 : vector<2x32xf32> to vector<1x2x32xf32>
    %c0_7 = arith.constant 0 : index
    %c0_8 = arith.constant 0 : index
    %c0_9 = arith.constant 0 : index
    %18 = vector.load %arg3[%c0_7, %c0_8, %c0_9] : memref<1x2x32xf32, #tpu.memory_space<vmem>>, vector<1x2x32xf32>
    tpu.vector_store %arg3[%c0_7, %c0_8, %c0_9], %17 {strides = array<i32>} : memref<1x2x32xf32, #tpu.memory_space<vmem>>, vector<1x2x32xf32>,
    return
  }
  func.func @transform_0(%arg0: i32) -> (i32, i32) {
    %c0_i32 = arith.constant 0 : i32
    %c0_i32_0 = arith.constant 0 : i32
    return %arg0, %c0_i32 : i32, i32
  }
  func.func @transform_1(%arg0: i32) -> (i32, i32) {
    %c0_i32 = arith.constant 0 : i32
    %c0_i32_0 = arith.constant 0 : i32
    %c0_i32_1 = arith.constant 0 : i32
    return %c0_i32, %c0_i32_0 : i32, i32
  }
  func.func @transform_2(%arg0: i32) -> (i32, i32, i32) {
    %c0_i32 = arith.constant 0 : i32
    %c0_i32_0 = arith.constant 0 : i32
    %c0_i32_1 = arith.constant 0 : i32
    return %arg0, %c0_i32, %c0_i32_0 : i32, i32, i32
  }
}

module attributes {stable_mosaic.version = 11 : i64} {
  func.func @_stem1_pass2_kernel(%arg0: i32, %arg1: memref<128x36xbf16, #tpu.memory_space<vmem>>, %arg2: memref<36x32xbf16, #tpu.memory_space<vmem>>, %arg3: memref<1x32xf32, #tpu.memory_space<vmem>>, %arg4: memref<1x32xf32, #tpu.memory_space<vmem>>, %arg5: memref<32x16xbf16, #tpu.memory_space<vmem>>, %arg6: memref<128x32xbf16, #tpu.memory_space<vmem>>, %arg7: memref<128x16xbf16, #tpu.memory_space<vmem>>, %arg8: memref<1x2x16xf32, #tpu.memory_space<vmem>>) attributes {dimension_semantics = [#tpu.dimension_semantics<parallel>], iteration_bounds = array<i64: 1>, scalar_prefetch = 0 : i64, scratch_operands = 0 : i64, tpu.core_type = #tpu.core_type<tc>, window_params = [{transform_indices = @transform_0, window_bounds = array<i64: 128, 36>}, {pipeline_mode = #tpu.pipeline_mode<synchronous>, transform_indices = @transform_1, window_bounds = array<i64: 36, 32>}, {pipeline_mode = #tpu.pipeline_mode<synchronous>, transform_indices = @transform_2, window_bounds = array<i64: 1, 32>}, {pipeline_mode = #tpu.pipeline_mode<synchronous>, transform_indices = @transform_3, window_bounds = array<i64: 1, 32>}, {pipeline_mode = #tpu.pipeline_mode<synchronous>, transform_indices = @transform_4, window_bounds = array<i64: 32, 16>}, {transform_indices = @transform_5, window_bounds = array<i64: 128, 32>}, {transform_indices = @transform_6, window_bounds = array<i64: 128, 16>}, {transform_indices = @transform_7, window_bounds = array<i64: 1, 2, 16>}]} {
    %c0 = arith.constant 0 : index
    %c0_0 = arith.constant 0 : index
    %0 = vector.load %arg1[%c0, %c0_0] : memref<128x36xbf16, #tpu.memory_space<vmem>>, vector<128x36xbf16>
    %c0_1 = arith.constant 0 : index
    %c0_2 = arith.constant 0 : index
    %1 = vector.load %arg2[%c0_1, %c0_2] : memref<36x32xbf16, #tpu.memory_space<vmem>>, vector<36x32xbf16>
    %cst = arith.constant dense<0.000000e+00> : vector<128x32xf32>
    %2 = tpu.matmul %0, %1, %cst {dimension_numbers = #tpu.dot_dimension_numbers<[1], [0], [0], [1], [0, 0, 1, 1], [], []>} : vector<128x36xbf16>, vector<36x32xbf16>, vector<128x32xf32> -> vector<128x32xf32>
    %c0_3 = arith.constant 0 : index
    %c0_4 = arith.constant 0 : index
    %3 = vector.load %arg3[%c0_3, %c0_4] : memref<1x32xf32, #tpu.memory_space<vmem>>, vector<1x32xf32>
    %4 = vector.broadcast %3 : vector<1x32xf32> to vector<128x32xf32>
    %5 = arith.mulf %2, %4 : vector<128x32xf32>
    %c0_5 = arith.constant 0 : index
    %c0_6 = arith.constant 0 : index
    %6 = vector.load %arg4[%c0_5, %c0_6] : memref<1x32xf32, #tpu.memory_space<vmem>>, vector<1x32xf32>
    %7 = vector.broadcast %6 : vector<1x32xf32> to vector<128x32xf32>
    %8 = arith.addf %5, %7 : vector<128x32xf32>
    %cst_7 = arith.constant 0.000000e+00 : f32
    %9 = vector.broadcast %cst_7 : f32 to vector<128x32xf32>
    %10 = arith.maximumf %8, %9 : vector<128x32xf32>
    %11 = arith.truncf %10 : vector<128x32xf32> to vector<128x32xbf16>
    %c0_8 = arith.constant 0 : index
    %c0_9 = arith.constant 0 : index
    %12 = vector.load %arg6[%c0_8, %c0_9] : memref<128x32xbf16, #tpu.memory_space<vmem>>, vector<128x32xbf16>
    tpu.vector_store %arg6[%c0_8, %c0_9], %11 {strides = array<i32>} : memref<128x32xbf16, #tpu.memory_space<vmem>>, vector<128x32xbf16>,
    %13 = arith.truncf %10 : vector<128x32xf32> to vector<128x32xbf16>
    %c0_10 = arith.constant 0 : index
    %c0_11 = arith.constant 0 : index
    %14 = vector.load %arg5[%c0_10, %c0_11] : memref<32x16xbf16, #tpu.memory_space<vmem>>, vector<32x16xbf16>
    %cst_12 = arith.constant dense<0.000000e+00> : vector<128x16xf32>
    %15 = tpu.matmul %13, %14, %cst_12 {dimension_numbers = #tpu.dot_dimension_numbers<[1], [0], [0], [1], [0, 0, 1, 1], [], []>} : vector<128x32xbf16>, vector<32x16xbf16>, vector<128x16xf32> -> vector<128x16xf32>
    %16 = arith.truncf %15 : vector<128x16xf32> to vector<128x16xbf16>
    %c0_13 = arith.constant 0 : index
    %c0_14 = arith.constant 0 : index
    %17 = vector.load %arg7[%c0_13, %c0_14] : memref<128x16xbf16, #tpu.memory_space<vmem>>, vector<128x16xbf16>
    tpu.vector_store %arg7[%c0_13, %c0_14], %16 {strides = array<i32>} : memref<128x16xbf16, #tpu.memory_space<vmem>>, vector<128x16xbf16>,
    %c128_i32 = arith.constant 128 : i32
    %18 = arith.muli %arg0, %c128_i32 : i32
    %c128_i32_15 = arith.constant 128 : i32
    %19 = arith.subi %c128_i32_15, %18 : i32
    %c128_i32_16 = arith.constant 128 : i32
    %20 = arith.minsi %c128_i32_16, %19 : i32
    %cst_17 = arith.constant dense<0.000000e+00> : vector<16xf32>
    %21 = vector.multi_reduction <add>, %15, %cst_17 [0] : vector<128x16xf32> to vector<16xf32>
    %22 = vector.shape_cast %21 : vector<16xf32> to vector<1x16xf32>
    %23 = arith.sitofp %20 : i32 to f32
    %24 = vector.broadcast %23 : f32 to vector<1x16xf32>
    %25 = arith.divf %22, %24 : vector<1x16xf32>
    %26 = vector.broadcast %25 : vector<1x16xf32> to vector<128x16xf32>
    %27 = arith.subf %15, %26 : vector<128x16xf32>
    %28 = arith.mulf %27, %27 : vector<128x16xf32>
    %cst_18 = arith.constant dense<0.000000e+00> : vector<16xf32>
    %29 = vector.multi_reduction <add>, %28, %cst_18 [0] : vector<128x16xf32> to vector<16xf32>
    %30 = vector.shape_cast %29 : vector<16xf32> to vector<1x16xf32>
    %31 = tpu.concatenate %22, %30 in 0 : vector<1x16xf32>, vector<1x16xf32> -> vector<2x16xf32>
    %32 = vector.shape_cast %31 : vector<2x16xf32> to vector<1x2x16xf32>
    %c0_19 = arith.constant 0 : index
    %c0_20 = arith.constant 0 : index
    %c0_21 = arith.constant 0 : index
    %33 = vector.load %arg8[%c0_19, %c0_20, %c0_21] : memref<1x2x16xf32, #tpu.memory_space<vmem>>, vector<1x2x16xf32>
    tpu.vector_store %arg8[%c0_19, %c0_20, %c0_21], %32 {strides = array<i32>} : memref<1x2x16xf32, #tpu.memory_space<vmem>>, vector<1x2x16xf32>,
    return
  }
  func.func @transform_0(%arg0: i32) -> (i32, i32) {
    %c0_i32 = arith.constant 0 : i32
    %c0_i32_0 = arith.constant 0 : i32
    return %arg0, %c0_i32 : i32, i32
  }
  func.func @transform_1(%arg0: i32) -> (i32, i32) {
    %c0_i32 = arith.constant 0 : i32
    %c0_i32_0 = arith.constant 0 : i32
    %c0_i32_1 = arith.constant 0 : i32
    return %c0_i32, %c0_i32_0 : i32, i32
  }
  func.func @transform_2(%arg0: i32) -> (i32, i32) {
    %c0_i32 = arith.constant 0 : i32
    %c0_i32_0 = arith.constant 0 : i32
    %c0_i32_1 = arith.constant 0 : i32
    return %c0_i32, %c0_i32_0 : i32, i32
  }
  func.func @transform_3(%arg0: i32) -> (i32, i32) {
    %c0_i32 = arith.constant 0 : i32
    %c0_i32_0 = arith.constant 0 : i32
    %c0_i32_1 = arith.constant 0 : i32
    return %c0_i32, %c0_i32_0 : i32, i32
  }
  func.func @transform_4(%arg0: i32) -> (i32, i32) {
    %c0_i32 = arith.constant 0 : i32
    %c0_i32_0 = arith.constant 0 : i32
    %c0_i32_1 = arith.constant 0 : i32
    return %c0_i32, %c0_i32_0 : i32, i32
  }
  func.func @transform_5(%arg0: i32) -> (i32, i32) {
    %c0_i32 = arith.constant 0 : i32
    %c0_i32_0 = arith.constant 0 : i32
    return %arg0, %c0_i32 : i32, i32
  }
  func.func @transform_6(%arg0: i32) -> (i32, i32) {
    %c0_i32 = arith.constant 0 : i32
    %c0_i32_0 = arith.constant 0 : i32
    return %arg0, %c0_i32 : i32, i32
  }
  func.func @transform_7(%arg0: i32) -> (i32, i32, i32) {
    %c0_i32 = arith.constant 0 : i32
    %c0_i32_0 = arith.constant 0 : i32
    %c0_i32_1 = arith.constant 0 : i32
    return %arg0, %c0_i32, %c0_i32_0 : i32, i32, i32
  }
}

module attributes {stable_mosaic.version = 11 : i64} {
  func.func @_bn_relu_kernel(%arg0: i32, %arg1: memref<16x128xbf16, #tpu.memory_space<vmem>>, %arg2: memref<1x128xf32, #tpu.memory_space<vmem>>, %arg3: memref<1x128xf32, #tpu.memory_space<vmem>>, %arg4: memref<16x128xbf16, #tpu.memory_space<vmem>>) attributes {dimension_semantics = [#tpu.dimension_semantics<parallel>], iteration_bounds = array<i64: 1>, scalar_prefetch = 0 : i64, scratch_operands = 0 : i64, tpu.core_type = #tpu.core_type<tc>, window_params = [{transform_indices = @transform_0, window_bounds = array<i64: 16, 128>}, {pipeline_mode = #tpu.pipeline_mode<synchronous>, transform_indices = @transform_1, window_bounds = array<i64: 1, 128>}, {pipeline_mode = #tpu.pipeline_mode<synchronous>, transform_indices = @transform_2, window_bounds = array<i64: 1, 128>}, {transform_indices = @transform_3, window_bounds = array<i64: 16, 128>}]} {
    %c0 = arith.constant 0 : index
    %c0_0 = arith.constant 0 : index
    %0 = vector.load %arg1[%c0, %c0_0] : memref<16x128xbf16, #tpu.memory_space<vmem>>, vector<16x128xbf16>
    %1 = arith.extf %0 : vector<16x128xbf16> to vector<16x128xf32>
    %c0_1 = arith.constant 0 : index
    %c0_2 = arith.constant 0 : index
    %2 = vector.load %arg2[%c0_1, %c0_2] : memref<1x128xf32, #tpu.memory_space<vmem>>, vector<1x128xf32>
    %3 = vector.broadcast %2 : vector<1x128xf32> to vector<16x128xf32>
    %4 = arith.mulf %1, %3 : vector<16x128xf32>
    %c0_3 = arith.constant 0 : index
    %c0_4 = arith.constant 0 : index
    %5 = vector.load %arg3[%c0_3, %c0_4] : memref<1x128xf32, #tpu.memory_space<vmem>>, vector<1x128xf32>
    %6 = vector.broadcast %5 : vector<1x128xf32> to vector<16x128xf32>
    %7 = arith.addf %4, %6 : vector<16x128xf32>
    %cst = arith.constant 0.000000e+00 : f32
    %8 = vector.broadcast %cst : f32 to vector<16x128xf32>
    %9 = arith.maximumf %7, %8 : vector<16x128xf32>
    %10 = arith.truncf %9 : vector<16x128xf32> to vector<16x128xbf16>
    %c0_5 = arith.constant 0 : index
    %c0_6 = arith.constant 0 : index
    %11 = vector.load %arg4[%c0_5, %c0_6] : memref<16x128xbf16, #tpu.memory_space<vmem>>, vector<16x128xbf16>
    tpu.vector_store %arg4[%c0_5, %c0_6], %10 {strides = array<i32>} : memref<16x128xbf16, #tpu.memory_space<vmem>>, vector<16x128xbf16>,
    return
  }
  func.func @transform_0(%arg0: i32) -> (i32, i32) {
    %c0_i32 = arith.constant 0 : i32
    %c0_i32_0 = arith.constant 0 : i32
    return %arg0, %c0_i32 : i32, i32
  }
  func.func @transform_1(%arg0: i32) -> (i32, i32) {
    %c0_i32 = arith.constant 0 : i32
    %c0_i32_0 = arith.constant 0 : i32
    %c0_i32_1 = arith.constant 0 : i32
    return %c0_i32, %c0_i32_0 : i32, i32
  }
  func.func @transform_2(%arg0: i32) -> (i32, i32) {
    %c0_i32 = arith.constant 0 : i32
    %c0_i32_0 = arith.constant 0 : i32
    %c0_i32_1 = arith.constant 0 : i32
    return %c0_i32, %c0_i32_0 : i32, i32
  }
  func.func @transform_3(%arg0: i32) -> (i32, i32) {
    %c0_i32 = arith.constant 0 : i32
    %c0_i32_0 = arith.constant 0 : i32
    return %arg0, %c0_i32 : i32, i32
  }
}

module attributes {stable_mosaic.version = 11 : i64} {
  func.func @_matmul_emit_stats_kernel(%arg0: i32, %arg1: memref<32x144xbf16, #tpu.memory_space<vmem>>, %arg2: memref<144x32xbf16, #tpu.memory_space<vmem>>, %arg3: memref<32x32xbf16, #tpu.memory_space<vmem>>, %arg4: memref<1x2x32xf32, #tpu.memory_space<vmem>>) attributes {dimension_semantics = [#tpu.dimension_semantics<parallel>], iteration_bounds = array<i64: 1>, scalar_prefetch = 0 : i64, scratch_operands = 0 : i64, tpu.core_type = #tpu.core_type<tc>, window_params = [{transform_indices = @transform_0, window_bounds = array<i64: 32, 144>}, {pipeline_mode = #tpu.pipeline_mode<synchronous>, transform_indices = @transform_1, window_bounds = array<i64: 144, 32>}, {transform_indices = @transform_2, window_bounds = array<i64: 32, 32>}, {transform_indices = @transform_3, window_bounds = array<i64: 1, 2, 32>}]} {
    %c0 = arith.constant 0 : index
    %c0_0 = arith.constant 0 : index
    %0 = vector.load %arg1[%c0, %c0_0] : memref<32x144xbf16, #tpu.memory_space<vmem>>, vector<32x144xbf16>
    %c0_1 = arith.constant 0 : index
    %c0_2 = arith.constant 0 : index
    %1 = vector.load %arg2[%c0_1, %c0_2] : memref<144x32xbf16, #tpu.memory_space<vmem>>, vector<144x32xbf16>
    %cst = arith.constant dense<0.000000e+00> : vector<32x32xf32>
    %2 = tpu.matmul %0, %1, %cst {dimension_numbers = #tpu.dot_dimension_numbers<[1], [0], [0], [1], [0, 0, 1, 1], [], []>} : vector<32x144xbf16>, vector<144x32xbf16>, vector<32x32xf32> -> vector<32x32xf32>
    %3 = arith.truncf %2 : vector<32x32xf32> to vector<32x32xbf16>
    %c0_3 = arith.constant 0 : index
    %c0_4 = arith.constant 0 : index
    %4 = vector.load %arg3[%c0_3, %c0_4] : memref<32x32xbf16, #tpu.memory_space<vmem>>, vector<32x32xbf16>
    tpu.vector_store %arg3[%c0_3, %c0_4], %3 {strides = array<i32>} : memref<32x32xbf16, #tpu.memory_space<vmem>>, vector<32x32xbf16>,
    %c32_i32 = arith.constant 32 : i32
    %5 = arith.muli %arg0, %c32_i32 : i32
    %c32_i32_5 = arith.constant 32 : i32
    %6 = arith.subi %c32_i32_5, %5 : i32
    %c32_i32_6 = arith.constant 32 : i32
    %7 = arith.minsi %c32_i32_6, %6 : i32
    %cst_7 = arith.constant dense<0.000000e+00> : vector<32xf32>
    %8 = vector.multi_reduction <add>, %2, %cst_7 [0] : vector<32x32xf32> to vector<32xf32>
    %9 = vector.shape_cast %8 : vector<32xf32> to vector<1x32xf32>
    %10 = arith.sitofp %7 : i32 to f32
    %11 = vector.broadcast %10 : f32 to vector<1x32xf32>
    %12 = arith.divf %9, %11 : vector<1x32xf32>
    %13 = vector.broadcast %12 : vector<1x32xf32> to vector<32x32xf32>
    %14 = arith.subf %2, %13 : vector<32x32xf32>
    %15 = arith.mulf %14, %14 : vector<32x32xf32>
    %cst_8 = arith.constant dense<0.000000e+00> : vector<32xf32>
    %16 = vector.multi_reduction <add>, %15, %cst_8 [0] : vector<32x32xf32> to vector<32xf32>
    %17 = vector.shape_cast %16 : vector<32xf32> to vector<1x32xf32>
    %18 = tpu.concatenate %9, %17 in 0 : vector<1x32xf32>, vector<1x32xf32> -> vector<2x32xf32>
    %19 = vector.shape_cast %18 : vector<2x32xf32> to vector<1x2x32xf32>
    %c0_9 = arith.constant 0 : index
    %c0_10 = arith.constant 0 : index
    %c0_11 = arith.constant 0 : index
    %20 = vector.load %arg4[%c0_9, %c0_10, %c0_11] : memref<1x2x32xf32, #tpu.memory_space<vmem>>, vector<1x2x32xf32>
    tpu.vector_store %arg4[%c0_9, %c0_10, %c0_11], %19 {strides = array<i32>} : memref<1x2x32xf32, #tpu.memory_space<vmem>>, vector<1x2x32xf32>,
    return
  }
  func.func @transform_0(%arg0: i32) -> (i32, i32) {
    %c0_i32 = arith.constant 0 : i32
    %c0_i32_0 = arith.constant 0 : i32
    return %arg0, %c0_i32 : i32, i32
  }
  func.func @transform_1(%arg0: i32) -> (i32, i32) {
    %c0_i32 = arith.constant 0 : i32
    %c0_i32_0 = arith.constant 0 : i32
    %c0_i32_1 = arith.constant 0 : i32
    return %c0_i32, %c0_i32_0 : i32, i32
  }
  func.func @transform_2(%arg0: i32) -> (i32, i32) {
    %c0_i32 = arith.constant 0 : i32
    %c0_i32_0 = arith.constant 0 : i32
    return %arg0, %c0_i32 : i32, i32
  }
  func.func @transform_3(%arg0: i32) -> (i32, i32, i32) {
    %c0_i32 = arith.constant 0 : i32
    %c0_i32_0 = arith.constant 0 : i32
    %c0_i32_1 = arith.constant 0 : i32
    return %arg0, %c0_i32, %c0_i32_0 : i32, i32, i32
  }
}

module attributes {stable_mosaic.version = 11 : i64} {
  func.func @_bn_relu_kernel(%arg0: i32, %arg1: memref<4x256xbf16, #tpu.memory_space<vmem>>, %arg2: memref<1x256xf32, #tpu.memory_space<vmem>>, %arg3: memref<1x256xf32, #tpu.memory_space<vmem>>, %arg4: memref<4x256xbf16, #tpu.memory_space<vmem>>) attributes {dimension_semantics = [#tpu.dimension_semantics<parallel>], iteration_bounds = array<i64: 1>, scalar_prefetch = 0 : i64, scratch_operands = 0 : i64, tpu.core_type = #tpu.core_type<tc>, window_params = [{transform_indices = @transform_0, window_bounds = array<i64: 4, 256>}, {pipeline_mode = #tpu.pipeline_mode<synchronous>, transform_indices = @transform_1, window_bounds = array<i64: 1, 256>}, {pipeline_mode = #tpu.pipeline_mode<synchronous>, transform_indices = @transform_2, window_bounds = array<i64: 1, 256>}, {transform_indices = @transform_3, window_bounds = array<i64: 4, 256>}]} {
    %c0 = arith.constant 0 : index
    %c0_0 = arith.constant 0 : index
    %0 = vector.load %arg1[%c0, %c0_0] : memref<4x256xbf16, #tpu.memory_space<vmem>>, vector<4x256xbf16>
    %1 = arith.extf %0 : vector<4x256xbf16> to vector<4x256xf32>
    %c0_1 = arith.constant 0 : index
    %c0_2 = arith.constant 0 : index
    %2 = vector.load %arg2[%c0_1, %c0_2] : memref<1x256xf32, #tpu.memory_space<vmem>>, vector<1x256xf32>
    %3 = vector.broadcast %2 : vector<1x256xf32> to vector<4x256xf32>
    %4 = arith.mulf %1, %3 : vector<4x256xf32>
    %c0_3 = arith.constant 0 : index
    %c0_4 = arith.constant 0 : index
    %5 = vector.load %arg3[%c0_3, %c0_4] : memref<1x256xf32, #tpu.memory_space<vmem>>, vector<1x256xf32>
    %6 = vector.broadcast %5 : vector<1x256xf32> to vector<4x256xf32>
    %7 = arith.addf %4, %6 : vector<4x256xf32>
    %cst = arith.constant 0.000000e+00 : f32
    %8 = vector.broadcast %cst : f32 to vector<4x256xf32>
    %9 = arith.maximumf %7, %8 : vector<4x256xf32>
    %10 = arith.truncf %9 : vector<4x256xf32> to vector<4x256xbf16>
    %c0_5 = arith.constant 0 : index
    %c0_6 = arith.constant 0 : index
    %11 = vector.load %arg4[%c0_5, %c0_6] : memref<4x256xbf16, #tpu.memory_space<vmem>>, vector<4x256xbf16>
    tpu.vector_store %arg4[%c0_5, %c0_6], %10 {strides = array<i32>} : memref<4x256xbf16, #tpu.memory_space<vmem>>, vector<4x256xbf16>,
    return
  }
  func.func @transform_0(%arg0: i32) -> (i32, i32) {
    %c0_i32 = arith.constant 0 : i32
    %c0_i32_0 = arith.constant 0 : i32
    return %arg0, %c0_i32 : i32, i32
  }
  func.func @transform_1(%arg0: i32) -> (i32, i32) {
    %c0_i32 = arith.constant 0 : i32
    %c0_i32_0 = arith.constant 0 : i32
    %c0_i32_1 = arith.constant 0 : i32
    return %c0_i32, %c0_i32_0 : i32, i32
  }
  func.func @transform_2(%arg0: i32) -> (i32, i32) {
    %c0_i32 = arith.constant 0 : i32
    %c0_i32_0 = arith.constant 0 : i32
    %c0_i32_1 = arith.constant 0 : i32
    return %c0_i32, %c0_i32_0 : i32, i32
  }
  func.func @transform_3(%arg0: i32) -> (i32, i32) {
    %c0_i32 = arith.constant 0 : i32
    %c0_i32_0 = arith.constant 0 : i32
    return %arg0, %c0_i32 : i32, i32
  }
}

module attributes {stable_mosaic.version = 11 : i64} {
  func.func @_maxpool_kernel(%arg0: i32, %arg1: memref<16x4x64xbf16, #tpu.memory_space<vmem>>, %arg2: memref<8x4x32xbf16, #tpu.memory_space<vmem>>) attributes {dimension_semantics = [#tpu.dimension_semantics<parallel>], iteration_bounds = array<i64: 1>, scalar_prefetch = 0 : i64, scratch_operands = 0 : i64, tpu.core_type = #tpu.core_type<tc>, window_params = [{transform_indices = @transform_0, window_bounds = array<i64: 16, 4, 64>}, {transform_indices = @transform_1, window_bounds = array<i64: 8, 4, 32>}]} {
    %c0 = arith.constant 0 : index
    %c0_0 = arith.constant 0 : index
    %c0_1 = arith.constant 0 : index
    %0 = vector.load %arg1[%c0, %c0_0, %c0_1] : memref<16x4x64xbf16, #tpu.memory_space<vmem>>, vector<16x4x64xbf16>
    %1 = vector.shape_cast %0 : vector<16x4x64xbf16> to vector<8x2x4x64xbf16>
    %2 = vector.extract_strided_slice %1 {offsets = [0, 0, 0, 0], sizes = [8, 1, 4, 64], strides = [1, 1, 1, 1]} : vector<8x2x4x64xbf16> to vector<8x1x4x64xbf16>
    %3 = vector.shape_cast %2 : vector<8x1x4x64xbf16> to vector<8x4x64xbf16>
    %4 = vector.extract_strided_slice %1 {offsets = [0, 1, 0, 0], sizes = [8, 1, 4, 64], strides = [1, 1, 1, 1]} : vector<8x2x4x64xbf16> to vector<8x1x4x64xbf16>
    %5 = vector.shape_cast %4 : vector<8x1x4x64xbf16> to vector<8x4x64xbf16>
    %6 = arith.maximumf %3, %5 : vector<8x4x64xbf16>
    %7 = vector.extract_strided_slice %6 {offsets = [0, 0, 0], sizes = [8, 4, 32], strides = [1, 1, 1]} : vector<8x4x64xbf16> to vector<8x4x32xbf16>
    %8 = vector.extract_strided_slice %6 {offsets = [0, 0, 32], sizes = [8, 4, 32], strides = [1, 1, 1]} : vector<8x4x64xbf16> to vector<8x4x32xbf16>
    %9 = arith.maximumf %7, %8 : vector<8x4x32xbf16>
    %c0_2 = arith.constant 0 : index
    %c0_3 = arith.constant 0 : index
    %c0_4 = arith.constant 0 : index
    %10 = vector.load %arg2[%c0_2, %c0_3, %c0_4] : memref<8x4x32xbf16, #tpu.memory_space<vmem>>, vector<8x4x32xbf16>
    tpu.vector_store %arg2[%c0_2, %c0_3, %c0_4], %9 {strides = array<i32>} : memref<8x4x32xbf16, #tpu.memory_space<vmem>>, vector<8x4x32xbf16>,
    return
  }
  func.func @transform_0(%arg0: i32) -> (i32, i32, i32) {
    %c0_i32 = arith.constant 0 : i32
    %c0_i32_0 = arith.constant 0 : i32
    %c0_i32_1 = arith.constant 0 : i32
    return %arg0, %c0_i32, %c0_i32_0 : i32, i32, i32
  }
  func.func @transform_1(%arg0: i32) -> (i32, i32, i32) {
    %c0_i32 = arith.constant 0 : i32
    %c0_i32_0 = arith.constant 0 : i32
    %c0_i32_1 = arith.constant 0 : i32
    return %arg0, %c0_i32, %c0_i32_0 : i32, i32, i32
  }
}

module attributes {stable_mosaic.version = 11 : i64} {
  func.func @_bn_relu_kernel(%arg0: i32, %arg1: memref<4x256xbf16, #tpu.memory_space<vmem>>, %arg2: memref<1x256xf32, #tpu.memory_space<vmem>>, %arg3: memref<1x256xf32, #tpu.memory_space<vmem>>, %arg4: memref<4x256xf32, #tpu.memory_space<vmem>>) attributes {dimension_semantics = [#tpu.dimension_semantics<parallel>], iteration_bounds = array<i64: 1>, scalar_prefetch = 0 : i64, scratch_operands = 0 : i64, tpu.core_type = #tpu.core_type<tc>, window_params = [{transform_indices = @transform_0, window_bounds = array<i64: 4, 256>}, {pipeline_mode = #tpu.pipeline_mode<synchronous>, transform_indices = @transform_1, window_bounds = array<i64: 1, 256>}, {pipeline_mode = #tpu.pipeline_mode<synchronous>, transform_indices = @transform_2, window_bounds = array<i64: 1, 256>}, {transform_indices = @transform_3, window_bounds = array<i64: 4, 256>}]} {
    %c0 = arith.constant 0 : index
    %c0_0 = arith.constant 0 : index
    %0 = vector.load %arg1[%c0, %c0_0] : memref<4x256xbf16, #tpu.memory_space<vmem>>, vector<4x256xbf16>
    %1 = arith.extf %0 : vector<4x256xbf16> to vector<4x256xf32>
    %c0_1 = arith.constant 0 : index
    %c0_2 = arith.constant 0 : index
    %2 = vector.load %arg2[%c0_1, %c0_2] : memref<1x256xf32, #tpu.memory_space<vmem>>, vector<1x256xf32>
    %3 = vector.broadcast %2 : vector<1x256xf32> to vector<4x256xf32>
    %4 = arith.mulf %1, %3 : vector<4x256xf32>
    %c0_3 = arith.constant 0 : index
    %c0_4 = arith.constant 0 : index
    %5 = vector.load %arg3[%c0_3, %c0_4] : memref<1x256xf32, #tpu.memory_space<vmem>>, vector<1x256xf32>
    %6 = vector.broadcast %5 : vector<1x256xf32> to vector<4x256xf32>
    %7 = arith.addf %4, %6 : vector<4x256xf32>
    %cst = arith.constant 0.000000e+00 : f32
    %8 = vector.broadcast %cst : f32 to vector<4x256xf32>
    %9 = arith.maximumf %7, %8 : vector<4x256xf32>
    %c0_5 = arith.constant 0 : index
    %c0_6 = arith.constant 0 : index
    %10 = vector.load %arg4[%c0_5, %c0_6] : memref<4x256xf32, #tpu.memory_space<vmem>>, vector<4x256xf32>
    tpu.vector_store %arg4[%c0_5, %c0_6], %9 {strides = array<i32>} : memref<4x256xf32, #tpu.memory_space<vmem>>, vector<4x256xf32>,
    return
  }
  func.func @transform_0(%arg0: i32) -> (i32, i32) {
    %c0_i32 = arith.constant 0 : i32
    %c0_i32_0 = arith.constant 0 : i32
    return %arg0, %c0_i32 : i32, i32
  }
  func.func @transform_1(%arg0: i32) -> (i32, i32) {
    %c0_i32 = arith.constant 0 : i32
    %c0_i32_0 = arith.constant 0 : i32
    %c0_i32_1 = arith.constant 0 : i32
    return %c0_i32, %c0_i32_0 : i32, i32
  }
  func.func @transform_2(%arg0: i32) -> (i32, i32) {
    %c0_i32 = arith.constant 0 : i32
    %c0_i32_0 = arith.constant 0 : i32
    %c0_i32_1 = arith.constant 0 : i32
    return %c0_i32, %c0_i32_0 : i32, i32
  }
  func.func @transform_3(%arg0: i32) -> (i32, i32) {
    %c0_i32 = arith.constant 0 : i32
    %c0_i32_0 = arith.constant 0 : i32
    return %arg0, %c0_i32 : i32, i32
  }
}

module attributes {stable_mosaic.version = 11 : i64} {
  func.func @_matmul_emit_stats_kernel(%arg0: i32, %arg1: memref<32x32xbf16, #tpu.memory_space<vmem>>, %arg2: memref<32x32xbf16, #tpu.memory_space<vmem>>, %arg3: memref<32x32xbf16, #tpu.memory_space<vmem>>, %arg4: memref<32x32xbf16, #tpu.memory_space<vmem>>, %arg5: memref<32x32xbf16, #tpu.memory_space<vmem>>, %arg6: memref<1x2x32xf32, #tpu.memory_space<vmem>>) attributes {dimension_semantics = [#tpu.dimension_semantics<parallel>], iteration_bounds = array<i64: 1>, scalar_prefetch = 0 : i64, scratch_operands = 0 : i64, tpu.core_type = #tpu.core_type<tc>, window_params = [{transform_indices = @transform_0, window_bounds = array<i64: 32, 32>}, {pipeline_mode = #tpu.pipeline_mode<synchronous>, transform_indices = @transform_1, window_bounds = array<i64: 32, 32>}, {transform_indices = @transform_2, window_bounds = array<i64: 32, 32>}, {pipeline_mode = #tpu.pipeline_mode<synchronous>, transform_indices = @transform_3, window_bounds = array<i64: 32, 32>}, {transform_indices = @transform_4, window_bounds = array<i64: 32, 32>}, {transform_indices = @transform_5, window_bounds = array<i64: 1, 2, 32>}]} {
    %c0 = arith.constant 0 : index
    %c0_0 = arith.constant 0 : index
    %0 = vector.load %arg1[%c0, %c0_0] : memref<32x32xbf16, #tpu.memory_space<vmem>>, vector<32x32xbf16>
    %c0_1 = arith.constant 0 : index
    %c0_2 = arith.constant 0 : index
    %1 = vector.load %arg2[%c0_1, %c0_2] : memref<32x32xbf16, #tpu.memory_space<vmem>>, vector<32x32xbf16>
    %cst = arith.constant dense<0.000000e+00> : vector<32x32xf32>
    %2 = tpu.matmul %0, %1, %cst {dimension_numbers = #tpu.dot_dimension_numbers<[1], [0], [0], [1], [0, 0, 1, 1], [], []>} : vector<32x32xbf16>, vector<32x32xbf16>, vector<32x32xf32> -> vector<32x32xf32>
    %c0_3 = arith.constant 0 : index
    %c0_4 = arith.constant 0 : index
    %3 = vector.load %arg3[%c0_3, %c0_4] : memref<32x32xbf16, #tpu.memory_space<vmem>>, vector<32x32xbf16>
    %c0_5 = arith.constant 0 : index
    %c0_6 = arith.constant 0 : index
    %4 = vector.load %arg4[%c0_5, %c0_6] : memref<32x32xbf16, #tpu.memory_space<vmem>>, vector<32x32xbf16>
    %cst_7 = arith.constant dense<0.000000e+00> : vector<32x32xf32>
    %5 = tpu.matmul %3, %4, %cst_7 {dimension_numbers = #tpu.dot_dimension_numbers<[1], [0], [0], [1], [0, 0, 1, 1], [], []>} : vector<32x32xbf16>, vector<32x32xbf16>, vector<32x32xf32> -> vector<32x32xf32>
    %6 = arith.addf %2, %5 : vector<32x32xf32>
    %7 = arith.truncf %6 : vector<32x32xf32> to vector<32x32xbf16>
    %c0_8 = arith.constant 0 : index
    %c0_9 = arith.constant 0 : index
    %8 = vector.load %arg5[%c0_8, %c0_9] : memref<32x32xbf16, #tpu.memory_space<vmem>>, vector<32x32xbf16>
    tpu.vector_store %arg5[%c0_8, %c0_9], %7 {strides = array<i32>} : memref<32x32xbf16, #tpu.memory_space<vmem>>, vector<32x32xbf16>,
    %c32_i32 = arith.constant 32 : i32
    %9 = arith.muli %arg0, %c32_i32 : i32
    %c32_i32_10 = arith.constant 32 : i32
    %10 = arith.subi %c32_i32_10, %9 : i32
    %c32_i32_11 = arith.constant 32 : i32
    %11 = arith.minsi %c32_i32_11, %10 : i32
    %cst_12 = arith.constant dense<0.000000e+00> : vector<32xf32>
    %12 = vector.multi_reduction <add>, %6, %cst_12 [0] : vector<32x32xf32> to vector<32xf32>
    %13 = vector.shape_cast %12 : vector<32xf32> to vector<1x32xf32>
    %14 = arith.sitofp %11 : i32 to f32
    %15 = vector.broadcast %14 : f32 to vector<1x32xf32>
    %16 = arith.divf %13, %15 : vector<1x32xf32>
    %17 = vector.broadcast %16 : vector<1x32xf32> to vector<32x32xf32>
    %18 = arith.subf %6, %17 : vector<32x32xf32>
    %19 = arith.mulf %18, %18 : vector<32x32xf32>
    %cst_13 = arith.constant dense<0.000000e+00> : vector<32xf32>
    %20 = vector.multi_reduction <add>, %19, %cst_13 [0] : vector<32x32xf32> to vector<32xf32>
    %21 = vector.shape_cast %20 : vector<32xf32> to vector<1x32xf32>
    %22 = tpu.concatenate %13, %21 in 0 : vector<1x32xf32>, vector<1x32xf32> -> vector<2x32xf32>
    %23 = vector.shape_cast %22 : vector<2x32xf32> to vector<1x2x32xf32>
    %c0_14 = arith.constant 0 : index
    %c0_15 = arith.constant 0 : index
    %c0_16 = arith.constant 0 : index
    %24 = vector.load %arg6[%c0_14, %c0_15, %c0_16] : memref<1x2x32xf32, #tpu.memory_space<vmem>>, vector<1x2x32xf32>
    tpu.vector_store %arg6[%c0_14, %c0_15, %c0_16], %23 {strides = array<i32>} : memref<1x2x32xf32, #tpu.memory_space<vmem>>, vector<1x2x32xf32>,
    return
  }
  func.func @transform_0(%arg0: i32) -> (i32, i32) {
    %c0_i32 = arith.constant 0 : i32
    %c0_i32_0 = arith.constant 0 : i32
    return %arg0, %c0_i32 : i32, i32
  }
  func.func @transform_1(%arg0: i32) -> (i32, i32) {
    %c0_i32 = arith.constant 0 : i32
    %c0_i32_0 = arith.constant 0 : i32
    %c0_i32_1 = arith.constant 0 : i32
    return %c0_i32, %c0_i32_0 : i32, i32
  }
  func.func @transform_2(%arg0: i32) -> (i32, i32) {
    %c0_i32 = arith.constant 0 : i32
    %c0_i32_0 = arith.constant 0 : i32
    return %arg0, %c0_i32 : i32, i32
  }
  func.func @transform_3(%arg0: i32) -> (i32, i32) {
    %c0_i32 = arith.constant 0 : i32
    %c0_i32_0 = arith.constant 0 : i32
    %c0_i32_1 = arith.constant 0 : i32
    return %c0_i32, %c0_i32_0 : i32, i32
  }
  func.func @transform_4(%arg0: i32) -> (i32, i32) {
    %c0_i32 = arith.constant 0 : i32
    %c0_i32_0 = arith.constant 0 : i32
    return %arg0, %c0_i32 : i32, i32
  }
  func.func @transform_5(%arg0: i32) -> (i32, i32, i32) {
    %c0_i32 = arith.constant 0 : i32
    %c0_i32_0 = arith.constant 0 : i32
    %c0_i32_1 = arith.constant 0 : i32
    return %arg0, %c0_i32, %c0_i32_0 : i32, i32, i32
  }
}

</mosaic_0001>

<bundles_post_ra>
// kernel: stem_block_forward.10
= control target key start
LH: loop header
LB: loop body
LE: loop exit
PB: predicated region body
PF: predicated region fallthrough
CT: control target
= control target key end

     0   :  { %s99_s0 = inlined_call_operand.vmem [shape: bf16[16,128], index: 0, kind: input, shape index: {}]   ;;  %s100_s1 = inlined_call_operand.vmem [shape: f32[1,128], index: 1, kind: input, shape index: {}]   ;;  %s101_s2 = inlined_call_operand.vmem [shape: f32[1,128], index: 2, kind: input, shape index: {}]   ;;  %s102_s3 = inlined_call_operand.vmem [shape: bf16[16,128], index: 3, kind: output, shape index: {}]  }
   0x1   :  { %v59_v0 = vld [vmem:[%s99_s0] sm:$0xff]  }
   0x2   :  { %v52_v1 = vld [vmem:[%s100_s1] ss:$0 sm:$0xff]  ;;  %v60_v2 = vunpack.c.l.bf16 %v59_v0  ;;  %v61_v3 = vunpack.c.h.bf16 %v59_v0 }
   0x3   :  { %v53_v4 = vld [vmem:[%s101_s2] ss:$0 sm:$0xff] }
   0x4   :  { %v25_v5 = vmul.f32 %v60_v2, %v52_v1  ;;  %v26_v6 = vmul.f32 %v61_v3, %v52_v1 }
   0x6   :  { %v34_v7 = vadd.f32 %v53_v4, %v25_v5  ;;  %v35_v8 = vadd.f32 %v53_v4, %v26_v6 }
   0x8   :  { %v36_v9 = vmax.f32 %v34_v7, 0.0  ;;  %v37_v10 = vmax.f32 %v35_v8, 0.0 }
   0xa   :  { %v65_v11 = vpack.c.bf16 %v37_v10, %v36_v9 }
   0xc   :  { %66 = vst [vmem:[%s102_s3] sm:$0xff] %v65_v11  }

// kernel: stem_block_forward.8
= control target key start
LH: loop header
LB: loop body
LE: loop exit
PB: predicated region body
PF: predicated region fallthrough
CT: control target
= control target key end

     0   :  { %vm113_vm0 = vcmask 1041408   ;;  %vm88_vm1 = vcmask 293888   ;;  %vm218_vm2 = vcmask 261120   ;;  %vm329_vm3 = vcmask 1040384   ;;  %s527_s1 = inlined_call_operand.vmem [shape: bf16[36,32], index: 1, kind: input, shape index: {}]   ;;  %s528_s0 = inlined_call_operand.vmem [shape: bf16[128,36], index: 0, kind: input, shape index: {}]   ;;  %s529_s2 = inlined_call_operand.vmem [shape: f32[1,2,32], index: 2, kind: output, shape index: {}]  }
   0x1   :  { %v397_v0 = vld [vmem:[%s527_s1 + $0x10] ss:$0 sps:$4 sm:$0x33]   ;;  %v398_v1 = vld [vmem:[%s527_s1 + $0x8] sm:$0xff]   ;;  %v400_v3 = vld [vmem:[%s528_s0] sm:$0xff]   ;;  %vm331_vm4 = vcmask 254976  }
   0x2   :  { %395 = vmatprep.subr.msk.bf16.mxu0 %vm113_vm0, %v397_v0  ;;  %v115_v2 = vsel %vm113_vm0, %v397_v0, 0  ;;  %396 = vmatprep.subr.msk.bf16.mxu1 %vm113_vm0, %v397_v0  ;;  %v399_v4 = vld [vmem:[%s527_s1] sm:$0xff]   ;;  %v401_v6 = vld [vmem:[%s528_s0 + $0x8] sm:$0xff]   ;;  %v402_v8 = vld [vmem:[%s528_s0 + $0x10] sm:$0xff]  }
   0x3   :  { %368 = vmatpush3.bf16.msra.mxu0 %v115_v2  ;;  %392 = vmatpush3.bf16.msra.mxu1 %v115_v2  ;;  %v404_v5 = vld [vmem:[%s528_s0 + $0x20] sm:$0xff]   ;;  %v405_v7 = vld [vmem:[%s528_s0 + $0x28] sm:$0xff]   ;;  %v406_v9 = vld [vmem:[%s528_s0 + $0x30] sm:$0xff]  }
   0x4   :  { %369 = vmatprep.subr.bf16.mxu0 %v398_v1  ;;  %390 = vmatprep.subr.bf16.mxu1 %v398_v1  ;;  %v403_v10 = vld [vmem:[%s528_s0 + $0x18] sm:$0xff]  }
   0x5   :  { %373 = vmatprep.mubr.msk.bf16.mxu0 %vm88_vm1, %v400_v3  ;;  %381 = vmatprep.mubr.msk.bf16.mxu1 %vm88_vm1, %v404_v5  ;;  %v407_v11 = vld [vmem:[%s528_s0 + $0x38] sm:$0xff]  }
   0x7   :  { %370 = vmatpush3.bf16.msra.mxu0 %v398_v1  ;;  %393 = vmatpush3.bf16.msra.mxu1 %v398_v1 }
   0x8   :  { %371 = vmatprep.subr.bf16.mxu0 %v399_v4  ;;  %391 = vmatprep.subr.bf16.mxu1 %v399_v4 }
   0xb   :  { %372 = vmatpush3.bf16.msra.mxu0 %v399_v4  ;;  %394 = vmatpush3.bf16.msra.mxu1 %v399_v4 }
   0xe   :  { %374 = vmatmul.mubr.msk.bf16.vlgmr.msra.gmra.mxu0 %vm88_vm1, %v401_v6  ;;  %382 = vmatmul.mubr.msk.bf16.vlgmr.msra.gmra.mxu1 %vm88_vm1, %v405_v7 }
   0xf   :  { %377 = vmatprep.mubr.msk.bf16.mxu0 %vm88_vm1, %v402_v8  ;;  %385 = vmatprep.mubr.msk.bf16.mxu1 %vm88_vm1, %v406_v9 }
  0x16   :  { %378 = vmatmul.mubr.msk.bf16.gmra.mxu0 %vm88_vm1, %v403_v10  ;;  %386 = vmatmul.mubr.msk.bf16.gmra.mxu1 %vm88_vm1, %v407_v11 }
  0xce   :  { %v375_v12 = vpop.f32.mrf.mxu0  ;;  %v464_v13 = vpop.f32.mrf.mxu1 }
  0xcf   :  { %v222_v23 = vsel %vm218_vm2, %v375_v12, 0.0  ;;  %v238_v46 = vsel %vm218_vm2, %v464_v13, 0.0 }
  0xd0   :  { %v151_v14 = vpop.f32.mrf.mxu0  ;;  %v466_v16 = vpop.f32.mrf.mxu1 }
  0xd1   :  { %v219_v18 = vsel %vm218_vm2, %v151_v14, 0.0  ;;  %v234_v41 = vsel %vm218_vm2, %v466_v16, 0.0 }
  0xd2   :  { %v376_v15 = vpop.f32.mrf.mxu0  ;;  %v470_v22 = vpop.f32.mrf.mxu1 }
  0xd3   :  { %v224_v26 = vsel %vm218_vm2, %v376_v15, 0.0  ;;  %v240_v48 = vsel %vm218_vm2, %v470_v22, 0.0 }
  0xd4   :  { %v154_v17 = vpop.f32.mrf.mxu0  ;;  %v186_v29 = vpop.f32.mrf.mxu1 }
  0xd5   :  { %v220_v19 = vsel %vm218_vm2, %v154_v17, 0.0  ;;  %v236_v43 = vsel %vm218_vm2, %v186_v29, 0.0 }
  0xd6   :  { %v221_v20 = vadd.f32 %v220_v19, %v219_v18  ;;  %v379_v21 = vpop.f32.mrf.mxu0  ;;  %v476_v35 = vpop.f32.mrf.mxu1 }
  0xd7   :  { %v230_v36 = vsel %vm218_vm2, %v379_v21, 0.0  ;;  %v246_v55 = vsel %vm218_vm2, %v476_v35, 0.0 }
  0xd8   :  { %v223_v24 = vadd.f32 %v222_v23, %v221_v20  ;;  %v167_v25 = vpop.f32.mrf.mxu0  ;;  %v480_v40 = vpop.f32.mrf.mxu1 }
  0xd9   :  { %v226_v30 = vsel %vm218_vm2, %v167_v25, 0.0  ;;  %v242_v51 = vsel %vm218_vm2, %v480_v40, 0.0 }
  0xda   :  { %v225_v27 = vadd.f32 %v224_v26, %v223_v24  ;;  %v380_v28 = vpop.f32.mrf.mxu0  ;;  %v485_v45 = vpop.f32.mrf.mxu1 }
  0xdb   :  { %v232_v38 = vsel %vm218_vm2, %v380_v28, 0.0  ;;  %v248_v57 = vsel %vm218_vm2, %v485_v45, 0.0 }
  0xdc   :  { %v227_v31 = vadd.f32 %v226_v30, %v225_v27  ;;  %v170_v32 = vpop.f32.mrf.mxu0  ;;  %v202_v50 = vpop.f32.mrf.mxu1 }
  0xdd   :  { %v228_v33 = vsel %vm218_vm2, %v170_v32, 0.0  ;;  %v244_v53 = vsel %vm218_vm2, %v202_v50, 0.0 }
  0xde   :  { %v229_v34 = vadd.f32 %v228_v33, %v227_v31 }
  0xe0   :  { %v231_v37 = vadd.f32 %v230_v36, %v229_v34 }
  0xe2   :  { %v233_v39 = vadd.f32 %v232_v38, %v231_v37 }
  0xe4   :  { %v235_v42 = vadd.f32 %v234_v41, %v233_v39 }
  0xe6   :  { %v237_v44 = vadd.f32 %v236_v43, %v235_v42 }
  0xe8   :  { %v239_v47 = vadd.f32 %v238_v46, %v237_v44 }
  0xea   :  { %v241_v49 = vadd.f32 %v240_v48, %v239_v47 }
  0xec   :  { %v243_v52 = vadd.f32 %v242_v51, %v241_v49 }
  0xee   :  { %v245_v54 = vadd.f32 %v244_v53, %v243_v52 }
  0xf0   :  { %v247_v56 = vadd.f32 %v246_v55, %v245_v54 }
  0xf2   :  { %v249_v58 = vadd.f32 %v248_v57, %v247_v56 }
  0xf4   :  { %v250_v59 = vrot.slane %v249_v58, 4 }
  0xf6   :  { %v251_v60 = vadd.f32 %v250_v59, %v249_v58 }
  0xf8   :  { %v252_v61 = vrot.slane %v251_v60, 2 }
  0xfa   :  { %v253_v62 = vadd.f32 %v252_v61, %v251_v60 }
  0xfc   :  { %v254_v63 = vrot.slane %v253_v62, 1 }
  0xfe   :  { %v498_v0 = vadd.f32 %v254_v63, %v253_v62 }
 0x100   :  { %v259_v1 = vmul.f32 0.0078125, %v498_v0 }
 0x102   :  { %v260_v2 = vsub.f32 %v151_v14, %v259_v1  ;;  %v261_v3 = vsub.f32 %v154_v17, %v259_v1  ;;  %v262_v4 = vsub.f32 %v375_v12, %v259_v1  ;;  %v263_v5 = vsub.f32 %v376_v15, %v259_v1 }
 0x103   :  { %v264_v8 = vsub.f32 %v167_v25, %v259_v1  ;;  %v265_v10 = vsub.f32 %v170_v32, %v259_v1  ;;  %v266_v23 = vsub.f32 %v379_v21, %v259_v1  ;;  %v267_v14 = vsub.f32 %v380_v28, %v259_v1 }
 0x104   :  { %v276_v6 = vmul.f32 %v260_v2, %v260_v2  ;;  %v277_v7 = vmul.f32 %v261_v3, %v261_v3  ;;  %v278_v9 = vmul.f32 %v262_v4, %v262_v4  ;;  %v279_v11 = vmul.f32 %v263_v5, %v263_v5 }
 0x105   :  { %v280_v24 = vmul.f32 %v264_v8, %v264_v8  ;;  %v281_v17 = vmul.f32 %v265_v10, %v265_v10  ;;  %v268_v25 = vsub.f32 %v466_v16, %v259_v1  ;;  %v282_v30 = vmul.f32 %v266_v23, %v266_v23 }
 0x106   :  { %v292_v18 = vsel %vm218_vm2, %v276_v6, 0.0  ;;  %v293_v19 = vsel %vm218_vm2, %v277_v7, 0.0  ;;  %v295_v26 = vsel %vm218_vm2, %v278_v9, 0.0  ;;  %v297_v12 = vsel %vm218_vm2, %v279_v11, 0.0 }
 0x107   :  { %v294_v20 = vadd.f32 %v293_v19, %v292_v18  ;;  %v299_v31 = vsel %vm218_vm2, %v280_v24, 0.0  ;;  %v269_v33 = vsub.f32 %v186_v29, %v259_v1  ;;  %v283_v34 = vmul.f32 %v267_v14, %v267_v14 }
 0x108   :  { %v301_v36 = vsel %vm218_vm2, %v281_v17, 0.0  ;;  %v270_v37 = vsub.f32 %v464_v13, %v259_v1  ;;  %v284_v38 = vmul.f32 %v268_v25, %v268_v25  ;;  %v303_v28 = vsel %vm218_vm2, %v282_v30, 0.0 }
 0x109   :  { %v296_v27 = vadd.f32 %v295_v26, %v294_v20  ;;  %v271_v41 = vsub.f32 %v470_v22, %v259_v1  ;;  %v285_v42 = vmul.f32 %v269_v33, %v269_v33  ;;  %v305_v16 = vsel %vm218_vm2, %v283_v34, 0.0 }
 0x10a   :  { %v272_v44 = vsub.f32 %v480_v40, %v259_v1  ;;  %v286_v46 = vmul.f32 %v270_v37, %v270_v37  ;;  %v307_v29 = vsel %vm218_vm2, %v284_v38, 0.0  ;;  %v273_v48 = vsub.f32 %v202_v50, %v259_v1 }
 0x10b   :  { %v298_v15 = vadd.f32 %v297_v12, %v296_v27  ;;  %v287_v49 = vmul.f32 %v271_v41, %v271_v41  ;;  %v309_v13 = vsel %vm218_vm2, %v285_v42, 0.0  ;;  %v274_v52 = vsub.f32 %v476_v35, %v259_v1 }
 0x10c   :  { %v288_v53 = vmul.f32 %v272_v44, %v272_v44  ;;  %v311_v22 = vsel %vm218_vm2, %v286_v46, 0.0  ;;  %v275_v55 = vsub.f32 %v485_v45, %v259_v1  ;;  %v289_v56 = vmul.f32 %v273_v48, %v273_v48 }
 0x10d   :  { %v300_v32 = vadd.f32 %v299_v31, %v298_v15  ;;  %v313_v40 = vsel %vm218_vm2, %v287_v49, 0.0  ;;  %v290_v58 = vmul.f32 %v274_v52, %v274_v52 }
 0x10e   :  { %v315_v59 = vsel %vm218_vm2, %v288_v53, 0.0  ;;  %v291_v60 = vmul.f32 %v275_v55, %v275_v55  ;;  %v317_v61 = vsel %vm218_vm2, %v289_v56, 0.0 }
 0x10f   :  { %v302_v21 = vadd.f32 %v301_v36, %v300_v32  ;;  %v319_v35 = vsel %vm218_vm2, %v290_v58, 0.0 }
 0x110   :  { %v321_v2 = vsel %vm218_vm2, %v291_v60, 0.0 }
 0x111   :  { %v304_v39 = vadd.f32 %v303_v28, %v302_v21 }
 0x113   :  { %v306_v43 = vadd.f32 %v305_v16, %v304_v39 }
 0x115   :  { %v308_v47 = vadd.f32 %v307_v29, %v306_v43 }
 0x117   :  { %v310_v51 = vadd.f32 %v309_v13, %v308_v47 }
 0x119   :  { %v312_v54 = vadd.f32 %v311_v22, %v310_v51 }
 0x11b   :  { %v314_v57 = vadd.f32 %v313_v40, %v312_v54 }
 0x11d   :  { %v316_v50 = vadd.f32 %v315_v59, %v314_v57 }
 0x11f   :  { %v318_v62 = vadd.f32 %v317_v61, %v316_v50 }
 0x121   :  { %v320_v63 = vadd.f32 %v319_v35, %v318_v62 }
 0x123   :  { %v322_v3 = vadd.f32 %v321_v2, %v320_v63 }
 0x125   :  { %v323_v4 = vrot.slane %v322_v3, 4 }
 0x127   :  { %v324_v45 = vadd.f32 %v323_v4, %v322_v3 }
 0x129   :  { %v325_v1 = vrot.slane %v324_v45, 2 }
 0x12b   :  { %v326_v5 = vadd.f32 %v325_v1, %v324_v45 }
 0x12d   :  { %v327_v6 = vrot.slane %v326_v5, 1 }
 0x12f   :  { %v328_v7 = vadd.f32 %v327_v6, %v326_v5 }
 0x131   :  { %v330_v8 = vsel %vm329_vm3, %v498_v0, %v328_v7 }
 0x132   :  { %332 = vst.msk [vmem:[%s529_s2] sm:$0x3] %vm331_vm4, %v330_v8 }

// kernel: stem_block_forward.9
= control target key start
LH: loop header
LB: loop body
LE: loop exit
PB: predicated region body
PF: predicated region fallthrough
CT: control target
= control target key end

     0   :  { %vm125_vm0 = vcmask 1041408   ;;  %vm100_vm1 = vcmask 293888   ;;  %vm352_vm2 = vcmask 257024   ;;  %vm385_vm3 = vcmask 261120   ;;  %s1279_s1 = inlined_call_operand.vmem [shape: bf16[36,32], index: 1, kind: input, shape index: {}]   ;;  %s1280_s0 = inlined_call_operand.vmem [shape: bf16[128,36], index: 0, kind: input, shape index: {}]   ;;  %s1281_s4 = inlined_call_operand.vmem [shape: bf16[32,16], index: 4, kind: input, shape index: {}]   ;;  %s1282_s2 = inlined_call_operand.vmem [shape: f32[1,32], index: 2, kind: input, shape index: {}]   ;;  %s1283_s3 = inlined_call_operand.vmem [shape: f32[1,32], index: 3, kind: input, shape index: {}]   ;;  %s1284_s5 = inlined_call_operand.vmem [shape: bf16[128,32], index: 5, kind: output, shape index: {0}]   ;;  %s1285_s6 = inlined_call_operand.vmem [shape: bf16[128,16], index: 6, kind: output, shape index: {1}]   ;;  %s1286_s7 = inlined_call_operand.vmem [shape: f32[1,2,16], index: 7, kind: output, shape index: {2}]  }
   0x1   :  { %v878_v0 = vld [vmem:[%s1279_s1 + $0x10] ss:$0 sps:$4 sm:$0x33]   ;;  %v879_v1 = vld [vmem:[%s1279_s1 + $0x8] sm:$0xff]   ;;  %v881_v3 = vld [vmem:[%s1280_s0] sm:$0xff]   ;;  %vm571_vm4 = vcmask 125952  }
   0x2   :  { %877 = vmatprep.subr.msk.bf16.mxu0 %vm125_vm0, %v878_v0  ;;  %v127_v2 = vsel %vm125_vm0, %v878_v0, 0  ;;  %v880_v4 = vld [vmem:[%s1279_s1] sm:$0xff]   ;;  %841 = vmatprep.mubr.msk.bf16.mxu0 %vm100_vm1, %v881_v3  ;;  %v882_v5 = vld [vmem:[%s1280_s0 + $0x8] sm:$0xff]   ;;  %v883_v6 = vld [vmem:[%s1280_s0 + $0x10] sm:$0xff]   ;;  %vm592_vm5 = vcmask 130048   ;;  %vm703_vm6 = vcmask 1040384  }
   0x3   :  { %836 = vmatpush3.bf16.msra.mxu0 %v127_v2  ;;  %v884_v7 = vld [vmem:[%s1280_s0 + $0x18] sm:$0xff]   ;;  %v885_v8 = vld [vmem:[%s1280_s0 + $0x20] sm:$0xff]   ;;  %v886_v9 = vld [vmem:[%s1280_s0 + $0x28] sm:$0xff]   ;;  %vm705_vm7 = vcmask 123904  }
   0x4   :  { %837 = vmatprep.subr.bf16.mxu0 %v879_v1  ;;  %v887_v10 = vld [vmem:[%s1280_s0 + $0x30] sm:$0xff]   ;;  %v888_v11 = vld [vmem:[%s1280_s0 + $0x38] sm:$0xff]   ;;  %v889_v12 = vld [vmem:[%s1281_s4 + $0x8] sm:$0xff]  }
   0x5   :  { %857 = vmatprep.subr.bf16.mxu1 %v889_v12  ;;  %v890_v13 = vld [vmem:[%s1281_s4] sm:$0xff]  }
   0x6   :  { %858 = vmatpush3.bf16.msra.mxu1 %v889_v12  ;;  %v981_v14 = vld [vmem:[%s1282_s2] ss:$0 sm:$0xff] }
   0x7   :  { %838 = vmatpush3.bf16.msra.mxu0 %v879_v1  ;;  %859 = vmatprep.subr.bf16.mxu1 %v890_v13  ;;  %v986_v16 = vld [vmem:[%s1283_s3] ss:$0 sm:$0xff] }
   0x8   :  { %839 = vmatprep.subr.bf16.mxu0 %v880_v4 }
   0xa   :  { %860 = vmatpush3.bf16.msra.mxu1 %v890_v13 }
   0xb   :  { %840 = vmatpush3.bf16.msra.mxu0 %v880_v4 }
   0xe   :  { %842 = vmatmul.mubr.msk.bf16.vlgmr.msra.gmra.mxu0 %vm100_vm1, %v882_v5 }
   0xf   :  { %845 = vmatprep.mubr.msk.bf16.mxu0 %vm100_vm1, %v883_v6 }
  0x16   :  { %846 = vmatmul.mubr.msk.bf16.gmra.mxu0 %vm100_vm1, %v884_v7 }
  0x17   :  { %849 = vmatprep.mubr.msk.bf16.mxu0 %vm100_vm1, %v885_v8 }
  0x1e   :  { %850 = vmatmul.mubr.msk.bf16.gmra.mxu0 %vm100_vm1, %v886_v9 }
  0x1f   :  { %853 = vmatprep.mubr.msk.bf16.mxu0 %vm100_vm1, %v887_v10 }
  0x26   :  { %854 = vmatmul.mubr.msk.bf16.gmra.mxu0 %vm100_vm1, %v888_v11 }
  0xce   :  { %v843_v15 = vpop.f32.mrf.mxu0 }
  0xcf   :  { %v235_v17 = vmul.f32 %v843_v15, %v981_v14 }
  0xd0   :  { %v163_v18 = vpop.f32.mrf.mxu0 }
  0xd1   :  { %v258_v19 = vadd.f32 %v986_v16, %v235_v17  ;;  %v233_v20 = vmul.f32 %v981_v14, %v163_v18 }
  0xd2   :  { %v844_v21 = vpop.f32.mrf.mxu0 }
  0xd3   :  { %v274_v22 = vmax.f32 %v258_v19, 0.0  ;;  %v256_v23 = vadd.f32 %v986_v16, %v233_v20  ;;  %v236_v24 = vmul.f32 %v844_v21, %v981_v14 }
  0xd4   :  { %v166_v25 = vpop.f32.mrf.mxu0 }
  0xd5   :  { %v784_v26 = vpack.c.bf16 %v274_v22, %v274_v22  ;;  %v272_v27 = vmax.f32 %v256_v23, 0.0  ;;  %v259_v28 = vadd.f32 %v986_v16, %v236_v24  ;;  %v234_v29 = vmul.f32 %v981_v14, %v166_v25 }
  0xd6   :  { %v847_v30 = vpop.f32.mrf.mxu0 }
  0xd7   :  { %355 = vst.msk [vmem:[%s1284_s5 + $0x8] sm:$0xf] %vm352_vm2, %v784_v26  ;;  %v782_v31 = vpack.c.bf16 %v272_v27, %v272_v27  ;;  %v275_v32 = vmax.f32 %v259_v28, 0.0  ;;  %v257_v33 = vadd.f32 %v986_v16, %v234_v29  ;;  %v239_v34 = vmul.f32 %v847_v30, %v981_v14 }
  0xd8   :  { %v179_v35 = vpop.f32.mrf.mxu0 }
  0xd9   :  { %353 = vst.msk [vmem:[%s1284_s5] sm:$0xf] %vm352_vm2, %v782_v31  ;;  %v785_v36 = vpack.c.bf16 %v275_v32, %v275_v32  ;;  %v273_v37 = vmax.f32 %v257_v33, 0.0  ;;  %v262_v38 = vadd.f32 %v986_v16, %v239_v34  ;;  %v237_v39 = vmul.f32 %v981_v14, %v179_v35 }
  0xda   :  { %v848_v40 = vpop.f32.mrf.mxu0  ;;  %v289_v45 = vpack.c.bf16 %v275_v32, %v274_v22 }
  0xdb   :  { %356 = vst.msk [vmem:[%s1284_s5 + $0xc] sm:$0xf] %vm352_vm2, %v785_v36  ;;  %v783_v41 = vpack.c.bf16 %v273_v37, %v273_v37  ;;  %v278_v42 = vmax.f32 %v262_v38, 0.0  ;;  %v240_v43 = vmul.f32 %v848_v40, %v981_v14  ;;  %v288_v44 = vpack.c.bf16 %v273_v37, %v272_v27 }
  0xdc   :  { %v260_v46 = vadd.f32 %v986_v16, %v237_v39  ;;  %v182_v47 = vpop.f32.mrf.mxu0 }
  0xdd   :  { %354 = vst.msk [vmem:[%s1284_s5 + $0x4] sm:$0xf] %vm352_vm2, %v783_v41  ;;  %v788_v48 = vpack.c.bf16 %v278_v42, %v278_v42  ;;  %v263_v49 = vadd.f32 %v986_v16, %v240_v43  ;;  %v238_v50 = vmul.f32 %v981_v14, %v182_v47  ;;  %861 = vmatprep.mubr.msk.bf16.mxu1 %vm385_vm3, %v288_v44 }
  0xde   :  { %v276_v51 = vmax.f32 %v260_v46, 0.0  ;;  %v851_v52 = vpop.f32.mrf.mxu0  ;;  %862 = vmatmul.mubr.msk.bf16.vlgmr.msra.gmra.mxu1 %vm385_vm3, %v289_v45 }
  0xdf   :  { %359 = vst.msk [vmem:[%s1284_s5 + $0x18] sm:$0xf] %vm352_vm2, %v788_v48  ;;  %v279_v53 = vmax.f32 %v263_v49, 0.0  ;;  %v261_v54 = vadd.f32 %v986_v16, %v238_v50  ;;  %v243_v55 = vmul.f32 %v851_v52, %v981_v14 }
  0xe0   :  { %v786_v56 = vpack.c.bf16 %v276_v51, %v276_v51  ;;  %v195_v57 = vpop.f32.mrf.mxu0 }
  0xe1   :  { %v789_v58 = vpack.c.bf16 %v279_v53, %v279_v53  ;;  %v277_v59 = vmax.f32 %v261_v54, 0.0  ;;  %v266_v60 = vadd.f32 %v986_v16, %v243_v55  ;;  %v241_v61 = vmul.f32 %v981_v14, %v195_v57 }
  0xe2   :  { %357 = vst.msk [vmem:[%s1284_s5 + $0x10] sm:$0xf] %vm352_vm2, %v786_v56  ;;  %v852_v62 = vpop.f32.mrf.mxu0  ;;  %v291_v3 = vpack.c.bf16 %v279_v53, %v278_v42 }
  0xe3   :  { %360 = vst.msk [vmem:[%s1284_s5 + $0x1c] sm:$0xf] %vm352_vm2, %v789_v58  ;;  %v290_v63 = vpack.c.bf16 %v277_v59, %v276_v51  ;;  %v787_v0 = vpack.c.bf16 %v277_v59, %v277_v59  ;;  %v282_v1 = vmax.f32 %v266_v60, 0.0  ;;  %v244_v2 = vmul.f32 %v852_v62, %v981_v14 }
  0xe4   :  { %v264_v4 = vadd.f32 %v986_v16, %v241_v61  ;;  %v198_v5 = vpop.f32.mrf.mxu0 }
  0xe5   :  { %358 = vst.msk [vmem:[%s1284_s5 + $0x14] sm:$0xf] %vm352_vm2, %v787_v0  ;;  %v792_v6 = vpack.c.bf16 %v282_v1, %v282_v1  ;;  %v267_v7 = vadd.f32 %v986_v16, %v244_v2  ;;  %v242_v8 = vmul.f32 %v981_v14, %v198_v5  ;;  %865 = vmatprep.mubr.msk.bf16.mxu1 %vm385_vm3, %v290_v63 }
  0xe6   :  { %v280_v9 = vmax.f32 %v264_v4, 0.0  ;;  %v855_v10 = vpop.f32.mrf.mxu0  ;;  %866 = vmatmul.mubr.msk.bf16.gmra.mxu1 %vm385_vm3, %v291_v3 }
  0xe7   :  { %363 = vst.msk [vmem:[%s1284_s5 + $0x28] sm:$0xf] %vm352_vm2, %v792_v6  ;;  %v283_v11 = vmax.f32 %v267_v7, 0.0  ;;  %v265_v12 = vadd.f32 %v986_v16, %v242_v8  ;;  %v247_v13 = vmul.f32 %v855_v10, %v981_v14 }
  0xe8   :  { %v790_v15 = vpack.c.bf16 %v280_v9, %v280_v9  ;;  %v211_v17 = vpop.f32.mrf.mxu0 }
  0xe9   :  { %v793_v18 = vpack.c.bf16 %v283_v11, %v283_v11  ;;  %v281_v19 = vmax.f32 %v265_v12, 0.0  ;;  %v270_v20 = vadd.f32 %v986_v16, %v247_v13  ;;  %v245_v21 = vmul.f32 %v981_v14, %v211_v17 }
  0xea   :  { %361 = vst.msk [vmem:[%s1284_s5 + $0x20] sm:$0xf] %vm352_vm2, %v790_v15  ;;  %v856_v22 = vpop.f32.mrf.mxu0  ;;  %v293_v27 = vpack.c.bf16 %v283_v11, %v282_v1 }
  0xeb   :  { %364 = vst.msk [vmem:[%s1284_s5 + $0x2c] sm:$0xf] %vm352_vm2, %v793_v18  ;;  %v292_v23 = vpack.c.bf16 %v281_v19, %v280_v9  ;;  %v791_v24 = vpack.c.bf16 %v281_v19, %v281_v19  ;;  %v286_v25 = vmax.f32 %v270_v20, 0.0  ;;  %v248_v26 = vmul.f32 %v856_v22, %v981_v14 }
  0xec   :  { %v268_v28 = vadd.f32 %v986_v16, %v245_v21  ;;  %v214_v29 = vpop.f32.mrf.mxu0 }
  0xed   :  { %362 = vst.msk [vmem:[%s1284_s5 + $0x24] sm:$0xf] %vm352_vm2, %v791_v24  ;;  %v796_v30 = vpack.c.bf16 %v286_v25, %v286_v25  ;;  %v271_v31 = vadd.f32 %v986_v16, %v248_v26  ;;  %v246_v32 = vmul.f32 %v981_v14, %v214_v29  ;;  %869 = vmatprep.mubr.msk.bf16.mxu1 %vm385_vm3, %v292_v23 }
  0xee   :  { %v284_v33 = vmax.f32 %v268_v28, 0.0  ;;  %870 = vmatmul.mubr.msk.bf16.gmra.mxu1 %vm385_vm3, %v293_v27 }
  0xef   :  { %367 = vst.msk [vmem:[%s1284_s5 + $0x38] sm:$0xf] %vm352_vm2, %v796_v30  ;;  %v287_v34 = vmax.f32 %v271_v31, 0.0  ;;  %v269_v35 = vadd.f32 %v986_v16, %v246_v32 }
  0xf0   :  { %v794_v36 = vpack.c.bf16 %v284_v33, %v284_v33 }
  0xf1   :  { %v797_v37 = vpack.c.bf16 %v287_v34, %v287_v34  ;;  %v285_v38 = vmax.f32 %v269_v35, 0.0  ;;  %v295_v40 = vpack.c.bf16 %v287_v34, %v286_v25 }
  0xf2   :  { %365 = vst.msk [vmem:[%s1284_s5 + $0x30] sm:$0xf] %vm352_vm2, %v794_v36 }
  0xf3   :  { %368 = vst.msk [vmem:[%s1284_s5 + $0x3c] sm:$0xf] %vm352_vm2, %v797_v37  ;;  %v294_v14 = vpack.c.bf16 %v285_v38, %v284_v33  ;;  %v795_v39 = vpack.c.bf16 %v285_v38, %v285_v38 }
  0xf5   :  { %366 = vst.msk [vmem:[%s1284_s5 + $0x34] sm:$0xf] %vm352_vm2, %v795_v39  ;;  %873 = vmatprep.mubr.msk.bf16.mxu1 %vm385_vm3, %v294_v14 }
  0xf6   :  { %874 = vmatmul.mubr.msk.bf16.gmra.mxu1 %vm385_vm3, %v295_v40 }
 0x19e   :  { %v1092_v16 = vpop.f32.mrf.mxu1 }
 0x19f   :  { %v800_v41 = vpack.c.bf16 %v1092_v16, %v1092_v16  ;;  %v596_v52 = vsel %vm592_vm5, %v1092_v16, 0.0 }
 0x1a0   :  { %v1096_v42 = vpop.f32.mrf.mxu1 }
 0x1a1   :  { %574 = vst.msk [vmem:[%s1285_s6 + $0x8] sm:$0xf] %vm571_vm4, %v800_v41  ;;  %v798_v43 = vpack.c.bf16 %v1096_v42, %v1096_v42  ;;  %v593_v47 = vsel %vm592_vm5, %v1096_v42, 0.0 }
 0x1a2   :  { %v1104_v44 = vpop.f32.mrf.mxu1 }
 0x1a3   :  { %572 = vst.msk [vmem:[%s1285_s6] sm:$0xf] %vm571_vm4, %v798_v43  ;;  %v801_v45 = vpack.c.bf16 %v1104_v44, %v1104_v44  ;;  %v598_v56 = vsel %vm592_vm5, %v1104_v44, 0.0 }
 0x1a4   :  { %v1112_v46 = vpop.f32.mrf.mxu1 }
 0x1a5   :  { %575 = vst.msk [vmem:[%s1285_s6 + $0xc] sm:$0xf] %vm571_vm4, %v801_v45  ;;  %v799_v48 = vpack.c.bf16 %v1112_v46, %v1112_v46  ;;  %v594_v49 = vsel %vm592_vm5, %v1112_v46, 0.0 }
 0x1a6   :  { %v595_v50 = vadd.f32 %v594_v49, %v593_v47  ;;  %v1124_v51 = vpop.f32.mrf.mxu1 }
 0x1a7   :  { %573 = vst.msk [vmem:[%s1285_s6 + $0x4] sm:$0xf] %vm571_vm4, %v799_v48  ;;  %v804_v53 = vpack.c.bf16 %v1124_v51, %v1124_v51  ;;  %v604_v4 = vsel %vm592_vm5, %v1124_v51, 0.0 }
 0x1a8   :  { %v597_v54 = vadd.f32 %v596_v52, %v595_v50  ;;  %v1134_v55 = vpop.f32.mrf.mxu1 }
 0x1a9   :  { %578 = vst.msk [vmem:[%s1285_s6 + $0x18] sm:$0xf] %vm571_vm4, %v804_v53  ;;  %v802_v57 = vpack.c.bf16 %v1134_v55, %v1134_v55  ;;  %v600_v60 = vsel %vm592_vm5, %v1134_v55, 0.0 }
 0x1aa   :  { %v599_v58 = vadd.f32 %v598_v56, %v597_v54  ;;  %v1144_v59 = vpop.f32.mrf.mxu1 }
 0x1ab   :  { %576 = vst.msk [vmem:[%s1285_s6 + $0x10] sm:$0xf] %vm571_vm4, %v802_v57  ;;  %v805_v61 = vpack.c.bf16 %v1144_v59, %v1144_v59  ;;  %v606_v8 = vsel %vm592_vm5, %v1144_v59, 0.0 }
 0x1ac   :  { %v601_v62 = vadd.f32 %v600_v60, %v599_v58  ;;  %v1154_v63 = vpop.f32.mrf.mxu1 }
 0x1ad   :  { %579 = vst.msk [vmem:[%s1285_s6 + $0x1c] sm:$0xf] %vm571_vm4, %v805_v61  ;;  %v803_v0 = vpack.c.bf16 %v1154_v63, %v1154_v63  ;;  %v602_v1 = vsel %vm592_vm5, %v1154_v63, 0.0 }
 0x1ae   :  { %v603_v2 = vadd.f32 %v602_v1, %v601_v62  ;;  %v1164_v3 = vpop.f32.mrf.mxu1 }
 0x1af   :  { %577 = vst.msk [vmem:[%s1285_s6 + $0x14] sm:$0xf] %vm571_vm4, %v803_v0  ;;  %v808_v5 = vpack.c.bf16 %v1164_v3, %v1164_v3  ;;  %v612_v22 = vsel %vm592_vm5, %v1164_v3, 0.0 }
 0x1b0   :  { %v605_v6 = vadd.f32 %v604_v4, %v603_v2  ;;  %v1174_v7 = vpop.f32.mrf.mxu1 }
 0x1b1   :  { %582 = vst.msk [vmem:[%s1285_s6 + $0x28] sm:$0xf] %vm571_vm4, %v808_v5  ;;  %v806_v9 = vpack.c.bf16 %v1174_v7, %v1174_v7  ;;  %v608_v12 = vsel %vm592_vm5, %v1174_v7, 0.0 }
 0x1b2   :  { %v607_v10 = vadd.f32 %v606_v8, %v605_v6  ;;  %v1184_v11 = vpop.f32.mrf.mxu1 }
 0x1b3   :  { %580 = vst.msk [vmem:[%s1285_s6 + $0x20] sm:$0xf] %vm571_vm4, %v806_v9  ;;  %v809_v13 = vpack.c.bf16 %v1184_v11, %v1184_v11  ;;  %v614_v26 = vsel %vm592_vm5, %v1184_v11, 0.0 }
 0x1b4   :  { %v609_v15 = vadd.f32 %v608_v12, %v607_v10  ;;  %v479_v17 = vpop.f32.mrf.mxu1 }
 0x1b5   :  { %583 = vst.msk [vmem:[%s1285_s6 + $0x2c] sm:$0xf] %vm571_vm4, %v809_v13  ;;  %v807_v18 = vpack.c.bf16 %v479_v17, %v479_v17  ;;  %v610_v19 = vsel %vm592_vm5, %v479_v17, 0.0 }
 0x1b6   :  { %v611_v20 = vadd.f32 %v610_v19, %v609_v15  ;;  %v1199_v21 = vpop.f32.mrf.mxu1 }
 0x1b7   :  { %581 = vst.msk [vmem:[%s1285_s6 + $0x24] sm:$0xf] %vm571_vm4, %v807_v18  ;;  %v812_v23 = vpack.c.bf16 %v1199_v21, %v1199_v21  ;;  %v620_v37 = vsel %vm592_vm5, %v1199_v21, 0.0 }
 0x1b8   :  { %v613_v24 = vadd.f32 %v612_v22, %v611_v20  ;;  %v1209_v25 = vpop.f32.mrf.mxu1 }
 0x1b9   :  { %586 = vst.msk [vmem:[%s1285_s6 + $0x38] sm:$0xf] %vm571_vm4, %v812_v23  ;;  %v810_v27 = vpack.c.bf16 %v1209_v25, %v1209_v25  ;;  %v616_v30 = vsel %vm592_vm5, %v1209_v25, 0.0 }
 0x1ba   :  { %v615_v28 = vadd.f32 %v614_v26, %v613_v24  ;;  %v1219_v29 = vpop.f32.mrf.mxu1 }
 0x1bb   :  { %584 = vst.msk [vmem:[%s1285_s6 + $0x30] sm:$0xf] %vm571_vm4, %v810_v27  ;;  %v813_v31 = vpack.c.bf16 %v1219_v29, %v1219_v29  ;;  %v622_v14 = vsel %vm592_vm5, %v1219_v29, 0.0 }
 0x1bc   :  { %v617_v32 = vadd.f32 %v616_v30, %v615_v28  ;;  %v495_v33 = vpop.f32.mrf.mxu1 }
 0x1bd   :  { %587 = vst.msk [vmem:[%s1285_s6 + $0x3c] sm:$0xf] %vm571_vm4, %v813_v31  ;;  %v811_v34 = vpack.c.bf16 %v495_v33, %v495_v33  ;;  %v618_v35 = vsel %vm592_vm5, %v495_v33, 0.0 }
 0x1be   :  { %v619_v36 = vadd.f32 %v618_v35, %v617_v32 }
 0x1bf   :  { %585 = vst.msk [vmem:[%s1285_s6 + $0x34] sm:$0xf] %vm571_vm4, %v811_v34 }
 0x1c0   :  { %v621_v38 = vadd.f32 %v620_v37, %v619_v36 }
 0x1c2   :  { %v623_v39 = vadd.f32 %v622_v14, %v621_v38 }
 0x1c4   :  { %v624_v40 = vrot.slane %v623_v39, 4 }
 0x1c6   :  { %v625_v41 = vadd.f32 %v624_v40, %v623_v39 }
 0x1c8   :  { %v626_v43 = vrot.slane %v625_v41, 2 }
 0x1ca   :  { %v627_v45 = vadd.f32 %v626_v43, %v625_v41 }
 0x1cc   :  { %v628_v47 = vrot.slane %v627_v45, 1 }
 0x1ce   :  { %v1242_v48 = vadd.f32 %v628_v47, %v627_v45 }
 0x1d0   :  { %v633_v49 = vmul.f32 0.0078125, %v1242_v48 }
 0x1d2   :  { %v634_v50 = vsub.f32 %v1096_v42, %v633_v49  ;;  %v635_v52 = vsub.f32 %v1112_v46, %v633_v49  ;;  %v636_v53 = vsub.f32 %v1092_v16, %v633_v49  ;;  %v637_v54 = vsub.f32 %v1104_v44, %v633_v49 }
 0x1d3   :  { %v638_v58 = vsub.f32 %v1134_v55, %v633_v49  ;;  %v639_v61 = vsub.f32 %v1154_v63, %v633_v49  ;;  %v640_v42 = vsub.f32 %v1124_v51, %v633_v49  ;;  %v641_v44 = vsub.f32 %v1144_v59, %v633_v49 }
 0x1d4   :  { %v650_v56 = vmul.f32 %v634_v50, %v634_v50  ;;  %v651_v57 = vmul.f32 %v635_v52, %v635_v52  ;;  %v652_v60 = vmul.f32 %v636_v53, %v636_v53  ;;  %v653_v62 = vmul.f32 %v637_v54, %v637_v54 }
 0x1d5   :  { %v654_v46 = vmul.f32 %v638_v58, %v638_v58  ;;  %v655_v5 = vmul.f32 %v639_v61, %v639_v61  ;;  %v642_v63 = vsub.f32 %v1174_v7, %v633_v49  ;;  %v656_v8 = vmul.f32 %v640_v42, %v640_v42 }
 0x1d6   :  { %v666_v0 = vsel %vm592_vm5, %v650_v56, 0.0  ;;  %v667_v1 = vsel %vm592_vm5, %v651_v57, 0.0  ;;  %v669_v16 = vsel %vm592_vm5, %v652_v60, 0.0  ;;  %v671_v55 = vsel %vm592_vm5, %v653_v62, 0.0 }
 0x1d7   :  { %v668_v2 = vadd.f32 %v667_v1, %v666_v0  ;;  %v673_v9 = vsel %vm592_vm5, %v654_v46, 0.0  ;;  %v643_v12 = vsub.f32 %v479_v17, %v633_v49  ;;  %v657_v13 = vmul.f32 %v641_v44, %v641_v44 }
 0x1d8   :  { %v675_v51 = vsel %vm592_vm5, %v655_v5, 0.0  ;;  %v644_v18 = vsub.f32 %v1164_v3, %v633_v49  ;;  %v658_v19 = vmul.f32 %v642_v63, %v642_v63  ;;  %v677_v59 = vsel %vm592_vm5, %v656_v8, 0.0 }
 0x1d9   :  { %v670_v4 = vadd.f32 %v669_v16, %v668_v2  ;;  %v645_v22 = vsub.f32 %v1184_v11, %v633_v49  ;;  %v659_v23 = vmul.f32 %v643_v12, %v643_v12  ;;  %v679_v7 = vsel %vm592_vm5, %v657_v13, 0.0 }
 0x1da   :  { %v646_v26 = vsub.f32 %v1209_v25, %v633_v49  ;;  %v660_v27 = vmul.f32 %v644_v18, %v644_v18  ;;  %v681_v17 = vsel %vm592_vm5, %v658_v19, 0.0  ;;  %v647_v30 = vsub.f32 %v495_v33, %v633_v49 }
 0x1db   :  { %v672_v6 = vadd.f32 %v671_v55, %v670_v4  ;;  %v661_v31 = vmul.f32 %v645_v22, %v645_v22  ;;  %v683_v3 = vsel %vm592_vm5, %v659_v23, 0.0  ;;  %v648_v34 = vsub.f32 %v1199_v21, %v633_v49 }
 0x1dc   :  { %v662_v35 = vmul.f32 %v646_v26, %v646_v26  ;;  %v685_v11 = vsel %vm592_vm5, %v660_v27, 0.0  ;;  %v649_v37 = vsub.f32 %v1219_v29, %v633_v49  ;;  %v663_v38 = vmul.f32 %v647_v30, %v647_v30 }
 0x1dd   :  { %v674_v10 = vadd.f32 %v673_v9, %v672_v6  ;;  %v687_v25 = vsel %vm592_vm5, %v661_v31, 0.0  ;;  %v664_v39 = vmul.f32 %v648_v34, %v648_v34 }
 0x1de   :  { %v689_v40 = vsel %vm592_vm5, %v662_v35, 0.0  ;;  %v665_v41 = vmul.f32 %v649_v37, %v649_v37  ;;  %v691_v43 = vsel %vm592_vm5, %v663_v38, 0.0 }
 0x1df   :  { %v676_v15 = vadd.f32 %v675_v51, %v674_v10  ;;  %v693_v21 = vsel %vm592_vm5, %v664_v39, 0.0 }
 0x1e0   :  { %v695_v50 = vsel %vm592_vm5, %v665_v41, 0.0 }
 0x1e1   :  { %v678_v20 = vadd.f32 %v677_v59, %v676_v15 }
 0x1e3   :  { %v680_v24 = vadd.f32 %v679_v7, %v678_v20 }
 0x1e5   :  { %v682_v28 = vadd.f32 %v681_v17, %v680_v24 }
 0x1e7   :  { %v684_v32 = vadd.f32 %v683_v3, %v682_v28 }
 0x1e9   :  { %v686_v36 = vadd.f32 %v685_v11, %v684_v32 }
 0x1eb   :  { %v688_v14 = vadd.f32 %v687_v25, %v686_v36 }
 0x1ed   :  { %v690_v33 = vadd.f32 %v689_v40, %v688_v14 }
 0x1ef   :  { %v692_v45 = vadd.f32 %v691_v43, %v690_v33 }
 0x1f1   :  { %v694_v47 = vadd.f32 %v693_v21, %v692_v45 }
 0x1f3   :  { %v696_v52 = vadd.f32 %v695_v50, %v694_v47 }
 0x1f5   :  { %v697_v53 = vrot.slane %v696_v52, 4 }
 0x1f7   :  { %v698_v29 = vadd.f32 %v697_v53, %v696_v52 }
 0x1f9   :  { %v699_v49 = vrot.slane %v698_v29, 2 }
 0x1fb   :  { %v700_v54 = vadd.f32 %v699_v49, %v698_v29 }
 0x1fd   :  { %v701_v56 = vrot.slane %v700_v54, 1 }
 0x1ff   :  { %v702_v57 = vadd.f32 %v701_v56, %v700_v54 }
 0x201   :  { %v704_v58 = vsel %vm703_vm6, %v1242_v48, %v702_v57 }
 0x202   :  { %706 = vst.msk [vmem:[%s1286_s7] sm:$0x3] %vm705_vm7, %v704_v58 }

// kernel: stem_block_forward.11
= control target key start
LH: loop header
LB: loop body
LE: loop exit
PB: predicated region body
PF: predicated region fallthrough
CT: control target
= control target key end

     0   :  { %v297_v0 = vmov 0   ;;  %vm108_vm0 = vcmask 130048   ;;  %vm180_vm1 = vcmask 257024   ;;  %vm189_vm2 = vcmask 261120   ;;  %s384_s1 = inlined_call_operand.vmem [shape: bf16[144,32], index: 1, kind: input, shape index: {}]   ;;  %s385_s0 = inlined_call_operand.vmem [shape: bf16[32,144], index: 0, kind: input, shape index: {}]   ;;  %s386_s2 = inlined_call_operand.vmem [shape: bf16[32,32], index: 2, kind: output, shape index: {0}]   ;;  %s387_s3 = inlined_call_operand.vmem [shape: f32[1,2,32], index: 3, kind: output, shape index: {1}]  }
   0x1   :  { %115 = vmatprep.subr.bf16.mxu0 %v297_v0  ;;  %263 = vmatprep.subr.bf16.mxu1 %v297_v0  ;;  %v282_v1 = vld [vmem:[%s384_s1 + $0x38] sm:$0xff]   ;;  %v283_v2 = vld [vmem:[%s384_s1 + $0x30] sm:$0xff]   ;;  %v284_v3 = vld [vmem:[%s384_s1 + $0x28] sm:$0xff]   ;;  %vm228_vm3 = vcmask 1040384   ;;  %vm230_vm4 = vcmask 254976  }
   0x2   :  { %116 = vmatpush1.bf16.msra.mxu0 %v282_v1  ;;  %272 = vmatpush1.bf16.msra.mxu1 %v282_v1  ;;  %v285_v4 = vld [vmem:[%s384_s1 + $0x20] sm:$0xff]   ;;  %v296_v6 = vld [vmem:[%s385_s0 + $0x14] ss:$8 sps:$4 sm:$0xff]   ;;  %v288_v9 = vld [vmem:[%s384_s1 + $0x8] sm:$0xff]  }
   0x3   :  { %117 = vmatprep.subr.bf16.mxu0 %v297_v0  ;;  %264 = vmatprep.subr.bf16.mxu1 %v297_v0  ;;  %v293_v5 = vld [vmem:[%s385_s0 + $0x4] ss:$8 sps:$4 sm:$0xff]   ;;  %v286_v7 = vld [vmem:[%s384_s1 + $0x18] sm:$0xff]   ;;  %v287_v8 = vld [vmem:[%s384_s1 + $0x10] sm:$0xff]  }
   0x4   :  { %253 = vmatprep.mubr.msk.bf16.mxu0 %vm108_vm0, %v293_v5  ;;  %254 = vmatprep.mubr.msk.bf16.mxu1 %vm108_vm0, %v296_v6  ;;  %v289_v10 = vld [vmem:[%s384_s1] sm:$0xff]   ;;  %v294_v13 = vld [vmem:[%s385_s0 + $0x10] ss:$8 sps:$4 sm:$0xff]  }
   0x5   :  { %v290_v11 = vld [vmem:[%s384_s1 + $0x40] sm:$0xff]  }
   0x6   :  { %118 = vmatpush1.bf16.msra.mxu0 %v283_v2  ;;  %273 = vmatpush1.bf16.msra.mxu1 %v283_v2  ;;  %v291_v12 = vld [vmem:[%s385_s0] ss:$8 sps:$4 sm:$0xff]  }
   0x7   :  { %119 = vmatprep.subr.bf16.mxu0 %v297_v0  ;;  %265 = vmatprep.subr.bf16.mxu1 %v297_v0 }
   0xa   :  { %120 = vmatpush1.bf16.msra.mxu0 %v284_v3  ;;  %274 = vmatpush1.bf16.msra.mxu1 %v284_v3 }
   0xb   :  { %121 = vmatprep.subr.bf16.mxu0 %v297_v0  ;;  %266 = vmatprep.subr.bf16.mxu1 %v297_v0 }
   0xe   :  { %122 = vmatpush1.bf16.msra.mxu0 %v285_v4  ;;  %275 = vmatpush1.bf16.msra.mxu1 %v285_v4 }
   0xf   :  { %123 = vmatprep.subr.bf16.mxu0 %v297_v0  ;;  %267 = vmatprep.subr.bf16.mxu1 %v297_v0 }
  0x12   :  { %124 = vmatpush1.bf16.msra.mxu0 %v286_v7  ;;  %276 = vmatpush1.bf16.msra.mxu1 %v286_v7 }
  0x13   :  { %125 = vmatprep.subr.bf16.mxu0 %v297_v0  ;;  %268 = vmatprep.subr.bf16.mxu1 %v297_v0 }
  0x16   :  { %126 = vmatpush1.bf16.msra.mxu0 %v287_v8  ;;  %277 = vmatpush1.bf16.msra.mxu1 %v287_v8 }
  0x17   :  { %127 = vmatprep.subr.bf16.mxu0 %v297_v0  ;;  %269 = vmatprep.subr.bf16.mxu1 %v297_v0 }
  0x1a   :  { %128 = vmatpush1.bf16.msra.mxu0 %v288_v9  ;;  %278 = vmatpush1.bf16.msra.mxu1 %v288_v9 }
  0x1b   :  { %129 = vmatprep.subr.bf16.mxu0 %v297_v0  ;;  %270 = vmatprep.subr.bf16.mxu1 %v297_v0 }
  0x1e   :  { %130 = vmatpush1.bf16.msra.mxu0 %v289_v10  ;;  %279 = vmatpush1.bf16.msra.mxu1 %v289_v10 }
  0x1f   :  { %145 = vmatprep.subr.bf16.mxu0 %v297_v0  ;;  %271 = vmatprep.subr.bf16.mxu1 %v297_v0 }
  0x22   :  { %146 = vmatpush2.bf16.msra.mxu0 %v290_v11  ;;  %280 = vmatpush2.bf16.msra.mxu1 %v290_v11 }
  0x25   :  { %148 = vmatmul.mubr.bf16.vlgmr.msra.gmra.mxu0 %v291_v12  ;;  %156 = vmatmul.mubr.bf16.vlgmr.msra.gmra.mxu1 %v294_v13 }
  0xe5   :  { %v149_v14 = vpop.f32.mrf.mxu0  ;;  %v157_v15 = vpop.f32.mrf.mxu1 }
  0xe6   :  { %v259_v16 = vpack.c.bf16 %v149_v14, %v149_v14  ;;  %v261_v17 = vpack.c.bf16 %v157_v15, %v157_v15  ;;  %v190_v22 = vsel %vm189_vm2, %v149_v14, 0.0  ;;  %v193_v29 = vsel %vm189_vm2, %v157_v15, 0.0 }
  0xe7   :  { %v151_v18 = vpop.f32.mrf.mxu0  ;;  %v159_v19 = vpop.f32.mrf.mxu1 }
  0xe8   :  { %181 = vst.msk [vmem:[%s386_s2] sm:$0xf] %vm180_vm1, %v259_v16  ;;  %183 = vst.msk [vmem:[%s386_s2 + $0x8] sm:$0xf] %vm180_vm1, %v261_v17 }
  0xe9   :  { %v152_v20 = vpop.f32.mrf.mxu0  ;;  %v160_v21 = vpop.f32.mrf.mxu1 }
  0xea   :  { %v260_v23 = vpack.c.bf16 %v152_v20, %v152_v20  ;;  %v191_v24 = vsel %vm189_vm2, %v152_v20, 0.0  ;;  %v262_v25 = vpack.c.bf16 %v160_v21, %v160_v21  ;;  %v195_v31 = vsel %vm189_vm2, %v160_v21, 0.0 }
  0xeb   :  { %v192_v26 = vadd.f32 %v191_v24, %v190_v22  ;;  %v154_v27 = vpop.f32.mrf.mxu0  ;;  %v162_v28 = vpop.f32.mrf.mxu1 }
  0xec   :  { %182 = vst.msk [vmem:[%s386_s2 + $0x4] sm:$0xf] %vm180_vm1, %v260_v23  ;;  %184 = vst.msk [vmem:[%s386_s2 + $0xc] sm:$0xf] %vm180_vm1, %v262_v25 }
  0xed   :  { %v194_v30 = vadd.f32 %v193_v29, %v192_v26 }
  0xef   :  { %v196_v32 = vadd.f32 %v195_v31, %v194_v30 }
  0xf1   :  { %v197_v33 = vrot.slane %v196_v32, 4 }
  0xf3   :  { %v198_v34 = vadd.f32 %v197_v33, %v196_v32 }
  0xf5   :  { %v199_v35 = vrot.slane %v198_v34, 2 }
  0xf7   :  { %v200_v36 = vadd.f32 %v199_v35, %v198_v34 }
  0xf9   :  { %v201_v37 = vrot.slane %v200_v36, 1 }
  0xfb   :  { %v202_v38 = vadd.f32 %v201_v37, %v200_v36 }
  0xfd   :  { %v206_v39 = vmul.f32 0.03125, %v202_v38 }
  0xff   :  { %v207_v40 = vsub.f32 %v149_v14, %v206_v39  ;;  %v208_v41 = vsub.f32 %v152_v20, %v206_v39  ;;  %v209_v42 = vsub.f32 %v157_v15, %v206_v39  ;;  %v210_v43 = vsub.f32 %v160_v21, %v206_v39 }
 0x101   :  { %v211_v44 = vmul.f32 %v207_v40, %v207_v40  ;;  %v212_v45 = vmul.f32 %v208_v41, %v208_v41  ;;  %v213_v46 = vmul.f32 %v209_v42, %v209_v42  ;;  %v214_v47 = vmul.f32 %v210_v43, %v210_v43 }
 0x103   :  { %v215_v48 = vsel %vm189_vm2, %v211_v44, 0.0  ;;  %v216_v49 = vsel %vm189_vm2, %v212_v45, 0.0  ;;  %v218_v51 = vsel %vm189_vm2, %v213_v46, 0.0  ;;  %v220_v53 = vsel %vm189_vm2, %v214_v47, 0.0 }
 0x104   :  { %v217_v50 = vadd.f32 %v216_v49, %v215_v48 }
 0x106   :  { %v219_v52 = vadd.f32 %v218_v51, %v217_v50 }
 0x108   :  { %v221_v54 = vadd.f32 %v220_v53, %v219_v52 }
 0x10a   :  { %v222_v55 = vrot.slane %v221_v54, 4 }
 0x10c   :  { %v223_v56 = vadd.f32 %v222_v55, %v221_v54 }
 0x10e   :  { %v224_v57 = vrot.slane %v223_v56, 2 }
 0x110   :  { %v225_v58 = vadd.f32 %v224_v57, %v223_v56 }
 0x112   :  { %v226_v59 = vrot.slane %v225_v58, 1 }
 0x114   :  { %v227_v60 = vadd.f32 %v226_v59, %v225_v58 }
 0x116   :  { %v229_v61 = vsel %vm228_vm3, %v202_v38, %v227_v60 }
 0x117   :  { %231 = vst.msk [vmem:[%s387_s3] sm:$0x3] %vm230_vm4, %v229_v61 }

// kernel: stem_block_forward.12
= control target key start
LH: loop header
LB: loop body
LE: loop exit
PB: predicated region body
PF: predicated region fallthrough
CT: control target
= control target key end

     0   :  { %v18_v0 = vlaneseq  ;;  %s98_s0 = inlined_call_operand.vmem [shape: bf16[4,256], index: 0, kind: input, shape index: {}]   ;;  %s99_s1 = inlined_call_operand.vmem [shape: f32[1,256], index: 1, kind: input, shape index: {}]   ;;  %s100_s2 = inlined_call_operand.vmem [shape: f32[1,256], index: 2, kind: input, shape index: {}]   ;;  %s101_s3 = inlined_call_operand.vmem [shape: bf16[4,256], index: 3, kind: output, shape index: {}]  }
   0x1   :  { %v14_v1 = vld [vmem:[%s98_s0] sm:$0xf] }
   0x2   :  { %v19_v2 = vshrl.u32 %v18_v0, 7  ;;  %v16_v3 = vld [vmem:[%s99_s1] sm:$0x3]  ;;  %v15_v7 = vunpack.c.l.bf16 %v14_v1 }
   0x3   :  { %v29_v4 = vld [vmem:[%s100_s2] sm:$0x3] }
   0x4   :  { %v20_v5 = vsub.s32 0, %v19_v2  ;;  %v24_v6 = vsub.s32 1, %v19_v2 }
   0x6   :  { %v21_v8 = vrot.slane %v16_v3, %v20_v5  ;;  %v25_v9 = vrot.slane %v16_v3, %v24_v6  ;;  %v34_v10 = vrot.slane %v29_v4, %v20_v5  ;;  %v38_v11 = vrot.slane %v29_v4, %v24_v6 }
   0x8   :  { %v26_v12 = vcombine.low %v21_v8, %v25_v9  ;;  %v39_v13 = vcombine.low %v34_v10, %v38_v11 }
   0xa   :  { %v28_v14 = vmul.f32 %v26_v12, %v15_v7 }
   0xc   :  { %v41_v15 = vadd.f32 %v39_v13, %v28_v14 }
   0xe   :  { %v42_v16 = vmax.f32 %v41_v15, 0.0 }
  0x10   :  { %v44_v17 = vcombine.high %v42_v16, %v42_v16 }
  0x12   :  { %v64_v18 = vpack.c.bf16 %v44_v17, %v42_v16 }
  0x14   :  { %65 = vst.sshfl [vmem:[%s101_s3] sm:$0x33 pattern:$0x76325410] %v64_v18 }

// kernel: stem_block_forward.13
= control target key start
LH: loop header
LB: loop body
LE: loop exit
PB: predicated region body
PF: predicated region fallthrough
CT: control target
= control target key end

     0   :  { %s86_s22 = smov 96   ;;  %vm72_vm0 = vcmask 254976   ;;  %s177_s0 = inlined_call_operand.vmem [shape: bf16[16,4,64], index: 0, kind: input, shape index: {}]   ;;  %s178_s1 = inlined_call_operand.vmem [shape: bf16[8,4,32], index: 1, kind: output, shape index: {}]  }
   0x1   :  { %v12_v0 = vld [vmem:[%s177_s0 + $0x8] sm:$0x3]  ;;  %v13_v1 = vld [vmem:[%s177_s0 + $0xa] sm:$0x3]  ;;  %v8_v2 = vld [vmem:[%s177_s0] sm:$0x3] }
   0x2   :  { %v26_v3 = vmax.bf16 %v13_v1, %v12_v0  ;;  %v9_v4 = vld [vmem:[%s177_s0 + $0x2] sm:$0x3]  ;;  %v14_v5 = vld [vmem:[%s177_s0 + $0xc] sm:$0x3]  ;;  %v15_v6 = vld [vmem:[%s177_s0 + $0xe] sm:$0x3] }
   0x3   :  { %v24_v7 = vmax.bf16 %v9_v4, %v8_v2  ;;  %v10_v8 = vld [vmem:[%s177_s0 + $0x4] sm:$0x3]  ;;  %v11_v9 = vld [vmem:[%s177_s0 + $0x6] sm:$0x3]  ;;  %v27_v10 = vmax.bf16 %v15_v6, %v14_v5  ;;  %v18_v12 = vld [vmem:[%s177_s0 + $0x14] sm:$0x3] }
   0x4   :  { %44 = vrot.lane.b32.xlu1 %v26_v3, %s86_s22  ;;  %v25_v11 = vmax.bf16 %v11_v9, %v10_v8  ;;  %v19_v13 = vld [vmem:[%s177_s0 + $0x16] sm:$0x3]  ;;  %v16_v14 = vld [vmem:[%s177_s0 + $0x10] sm:$0x3]  ;;  %v17_v15 = vld [vmem:[%s177_s0 + $0x12] sm:$0x3] }
   0x5   :  { %40 = vrot.lane.b32.xlu0 %v24_v7, %s86_s22  ;;  %v29_v16 = vmax.bf16 %v19_v13, %v18_v12  ;;  %v28_v17 = vmax.bf16 %v17_v15, %v16_v14  ;;  %v22_v18 = vld [vmem:[%s177_s0 + $0x1c] sm:$0x3]  ;;  %v23_v19 = vld [vmem:[%s177_s0 + $0x1e] sm:$0x3]  ;;  %v20_v20 = vld [vmem:[%s177_s0 + $0x18] sm:$0x3] }
   0x6   :  { %v21_v21 = vld [vmem:[%s177_s0 + $0x1a] sm:$0x3]  ;;  %v31_v22 = vmax.bf16 %v23_v19, %v22_v18 }
   0x7   :  { %v30_v23 = vmax.bf16 %v21_v21, %v20_v20 }
   0x8   :  { %46 = vrot.lane.b32.xlu1 %v27_v10, %s86_s22 }
   0x9   :  { %42 = vrot.lane.b32.xlu0 %v25_v11, %s86_s22 }
   0xc   :  { %50 = vrot.lane.b32.xlu1 %v29_v16, %s86_s22 }
   0xd   :  { %48 = vrot.lane.b32.xlu0 %v28_v17, %s86_s22 }
  0x10   :  { %54 = vrot.lane.b32.xlu1 %v31_v22, %s86_s22 }
  0x11   :  { %52 = vrot.lane.b32.xlu0 %v30_v23, %s86_s22 }
  0x76   :  { %v45_v24 = vpop.permute.xlu1 %44 }
  0x77   :  { %v66_v25 = vmax.bf16 %v45_v24, %v26_v3  ;;  %v41_v26 = vpop.permute.xlu0 %40 }
  0x78   :  { %v64_v27 = vmax.bf16 %v41_v26, %v24_v7 }
  0x79   :  { %75 = vst.msk [vmem:[%s178_s1 + $0x4] sm:$0x3] %vm72_vm0, %v66_v25 }
  0x7a   :  { %73 = vst.msk [vmem:[%s178_s1] sm:$0x3] %vm72_vm0, %v64_v27  ;;  %v47_v28 = vpop.permute.xlu1 %46 }
  0x7b   :  { %v67_v29 = vmax.bf16 %v47_v28, %v27_v10  ;;  %v43_v30 = vpop.permute.xlu0 %42 }
  0x7c   :  { %v65_v31 = vmax.bf16 %v43_v30, %v25_v11 }
  0x7d   :  { %76 = vst.msk [vmem:[%s178_s1 + $0x6] sm:$0x3] %vm72_vm0, %v67_v29 }
  0x7e   :  { %74 = vst.msk [vmem:[%s178_s1 + $0x2] sm:$0x3] %vm72_vm0, %v65_v31  ;;  %v51_v32 = vpop.permute.xlu1 %50 }
  0x7f   :  { %v69_v33 = vmax.bf16 %v51_v32, %v29_v16  ;;  %v49_v34 = vpop.permute.xlu0 %48 }
  0x80   :  { %v68_v35 = vmax.bf16 %v49_v34, %v28_v17 }
  0x81   :  { %78 = vst.msk [vmem:[%s178_s1 + $0xa] sm:$0x3] %vm72_vm0, %v69_v33 }
  0x82   :  { %77 = vst.msk [vmem:[%s178_s1 + $0x8] sm:$0x3] %vm72_vm0, %v68_v35  ;;  %v55_v36 = vpop.permute.xlu1 %54 }
  0x83   :  { %v71_v37 = vmax.bf16 %v55_v36, %v31_v22  ;;  %v53_v38 = vpop.permute.xlu0 %52 }
  0x84   :  { %v70_v39 = vmax.bf16 %v53_v38, %v30_v23 }
  0x85   :  { %80 = vst.msk [vmem:[%s178_s1 + $0xe] sm:$0x3] %vm72_vm0, %v71_v37 }
  0x86   :  { %79 = vst.msk [vmem:[%s178_s1 + $0xc] sm:$0x3] %vm72_vm0, %v70_v39 }

// kernel: stem_block_forward.15
= control target key start
LH: loop header
LB: loop body
LE: loop exit
PB: predicated region body
PF: predicated region fallthrough
CT: control target
= control target key end

     0   :  { %v18_v0 = vlaneseq  ;;  %s80_s0 = inlined_call_operand.vmem [shape: bf16[4,256], index: 0, kind: input, shape index: {}]   ;;  %s81_s1 = inlined_call_operand.vmem [shape: f32[1,256], index: 1, kind: input, shape index: {}]   ;;  %s82_s2 = inlined_call_operand.vmem [shape: f32[1,256], index: 2, kind: input, shape index: {}]   ;;  %s83_s3 = inlined_call_operand.vmem [shape: f32[4,256], index: 3, kind: output, shape index: {}]  }
   0x1   :  { %v14_v1 = vld [vmem:[%s80_s0] sm:$0xf] }
   0x2   :  { %v19_v2 = vshrl.u32 %v18_v0, 7  ;;  %v16_v3 = vld [vmem:[%s81_s1] sm:$0x3]  ;;  %v15_v7 = vunpack.c.l.bf16 %v14_v1 }
   0x3   :  { %v29_v4 = vld [vmem:[%s82_s2] sm:$0x3] }
   0x4   :  { %v20_v5 = vsub.s32 0, %v19_v2  ;;  %v24_v6 = vsub.s32 1, %v19_v2 }
   0x6   :  { %v21_v8 = vrot.slane %v16_v3, %v20_v5  ;;  %v25_v9 = vrot.slane %v16_v3, %v24_v6  ;;  %v34_v10 = vrot.slane %v29_v4, %v20_v5  ;;  %v38_v11 = vrot.slane %v29_v4, %v24_v6 }
   0x8   :  { %v26_v12 = vcombine.low %v21_v8, %v25_v9  ;;  %v39_v13 = vcombine.low %v34_v10, %v38_v11 }
   0xa   :  { %v28_v14 = vmul.f32 %v26_v12, %v15_v7 }
   0xc   :  { %v41_v15 = vadd.f32 %v39_v13, %v28_v14 }
   0xe   :  { %v42_v16 = vmax.f32 %v41_v15, 0.0 }
  0x10   :  { %43 = vst [vmem:[%s83_s3] sm:$0xff] %v42_v16 }

// kernel: stem_block_forward.14
= control target key start
LH: loop header
LB: loop body
LE: loop exit
PB: predicated region body
PF: predicated region fallthrough
CT: control target
= control target key end

     0   :  { %vm58_vm0 = vcmask 261120   ;;  %vm207_vm1 = vcmask 257024   ;;  %vm254_vm2 = vcmask 1040384   ;;  %vm256_vm3 = vcmask 254976   ;;  %s403_s3 = inlined_call_operand.vmem [shape: bf16[32,32], index: 3, kind: input, shape index: {}]   ;;  %s404_s1 = inlined_call_operand.vmem [shape: bf16[32,32], index: 1, kind: input, shape index: {}]   ;;  %s405_s2 = inlined_call_operand.vmem [shape: bf16[32,32], index: 2, kind: input, shape index: {}]   ;;  %s406_s0 = inlined_call_operand.vmem [shape: bf16[32,32], index: 0, kind: input, shape index: {}]   ;;  %s407_s4 = inlined_call_operand.vmem [shape: bf16[32,32], index: 4, kind: output, shape index: {0}]   ;;  %s408_s5 = inlined_call_operand.vmem [shape: f32[1,2,32], index: 5, kind: output, shape index: {1}]  }
   0x1   :  { %v310_v0 = vld [vmem:[%s403_s3 + $0x8] sm:$0xff]   ;;  %v312_v2 = vld [vmem:[%s403_s3] sm:$0xff]  }
   0x2   :  { %v311_v1 = vld [vmem:[%s404_s1 + $0x8] sm:$0xff]   ;;  %294 = vmatprep.subr.bf16.mxu0 %v310_v0  ;;  %v313_v3 = vld [vmem:[%s404_s1] sm:$0xff]  }
   0x3   :  { %302 = vmatprep.subr.bf16.mxu1 %v311_v1  ;;  %295 = vmatpush3.bf16.msra.mxu0 %v310_v0  ;;  %v314_v4 = vld [vmem:[%s405_s2] sm:$0xff]   ;;  %v316_v6 = vld [vmem:[%s405_s2 + $0x8] sm:$0xff]  }
   0x4   :  { %303 = vmatpush3.bf16.msra.mxu1 %v311_v1  ;;  %296 = vmatprep.subr.bf16.mxu0 %v312_v2  ;;  %v315_v5 = vld [vmem:[%s406_s0] sm:$0xff]   ;;  %v317_v7 = vld [vmem:[%s406_s0 + $0x8] sm:$0xff]  }
   0x5   :  { %304 = vmatprep.subr.bf16.mxu1 %v313_v3  ;;  %298 = vmatprep.mubr.msk.bf16.mxu0 %vm58_vm0, %v314_v4 }
   0x6   :  { %306 = vmatprep.mubr.msk.bf16.mxu1 %vm58_vm0, %v315_v5 }
   0x7   :  { %297 = vmatpush3.bf16.msra.mxu0 %v312_v2 }
   0x8   :  { %305 = vmatpush3.bf16.msra.mxu1 %v313_v3 }
   0xa   :  { %299 = vmatmul.mubr.msk.bf16.vlgmr.msra.gmra.mxu0 %vm58_vm0, %v316_v6 }
   0xb   :  { %307 = vmatmul.mubr.msk.bf16.vlgmr.msra.gmra.mxu1 %vm58_vm0, %v317_v7 }
  0xca   :  { %v300_v8 = vpop.f32.mrf.mxu0 }
  0xcb   :  { %v308_v9 = vpop.f32.mrf.mxu1 }
  0xcc   :  { %v185_v10 = vadd.f32 %v308_v9, %v300_v8  ;;  %v99_v11 = vpop.f32.mrf.mxu0 }
  0xcd   :  { %v176_v12 = vpop.f32.mrf.mxu1 }
  0xce   :  { %v284_v13 = vpack.c.bf16 %v185_v10, %v185_v10  ;;  %v177_v14 = vadd.f32 %v176_v12, %v99_v11  ;;  %v301_v15 = vpop.f32.mrf.mxu0  ;;  %v219_v27 = vsel %vm58_vm0, %v185_v10, 0.0 }
  0xcf   :  { %v309_v16 = vpop.f32.mrf.mxu1 }
  0xd0   :  { %210 = vst.msk [vmem:[%s407_s4 + $0x8] sm:$0xf] %vm207_vm1, %v284_v13  ;;  %v282_v17 = vpack.c.bf16 %v177_v14, %v177_v14  ;;  %v188_v18 = vadd.f32 %v309_v16, %v301_v15  ;;  %v102_v19 = vpop.f32.mrf.mxu0  ;;  %v216_v23 = vsel %vm58_vm0, %v177_v14, 0.0 }
  0xd1   :  { %v179_v20 = vpop.f32.mrf.mxu1 }
  0xd2   :  { %208 = vst.msk [vmem:[%s407_s4] sm:$0xf] %vm207_vm1, %v282_v17  ;;  %v285_v21 = vpack.c.bf16 %v188_v18, %v188_v18  ;;  %v180_v22 = vadd.f32 %v179_v20, %v102_v19  ;;  %v221_v29 = vsel %vm58_vm0, %v188_v18, 0.0 }
  0xd4   :  { %211 = vst.msk [vmem:[%s407_s4 + $0xc] sm:$0xf] %vm207_vm1, %v285_v21  ;;  %v283_v24 = vpack.c.bf16 %v180_v22, %v180_v22  ;;  %v217_v25 = vsel %vm58_vm0, %v180_v22, 0.0 }
  0xd5   :  { %v218_v26 = vadd.f32 %v217_v25, %v216_v23 }
  0xd6   :  { %209 = vst.msk [vmem:[%s407_s4 + $0x4] sm:$0xf] %vm207_vm1, %v283_v24 }
  0xd7   :  { %v220_v28 = vadd.f32 %v219_v27, %v218_v26 }
  0xd9   :  { %v222_v30 = vadd.f32 %v221_v29, %v220_v28 }
  0xdb   :  { %v223_v31 = vrot.slane %v222_v30, 4 }
  0xdd   :  { %v224_v32 = vadd.f32 %v223_v31, %v222_v30 }
  0xdf   :  { %v225_v33 = vrot.slane %v224_v32, 2 }
  0xe1   :  { %v226_v34 = vadd.f32 %v225_v33, %v224_v32 }
  0xe3   :  { %v227_v35 = vrot.slane %v226_v34, 1 }
  0xe5   :  { %v228_v36 = vadd.f32 %v227_v35, %v226_v34 }
  0xe7   :  { %v232_v37 = vmul.f32 0.03125, %v228_v36 }
  0xe9   :  { %v233_v38 = vsub.f32 %v177_v14, %v232_v37  ;;  %v234_v39 = vsub.f32 %v180_v22, %v232_v37  ;;  %v235_v40 = vsub.f32 %v185_v10, %v232_v37  ;;  %v236_v41 = vsub.f32 %v188_v18, %v232_v37 }
  0xeb   :  { %v237_v42 = vmul.f32 %v233_v38, %v233_v38  ;;  %v238_v43 = vmul.f32 %v234_v39, %v234_v39  ;;  %v239_v44 = vmul.f32 %v235_v40, %v235_v40  ;;  %v240_v45 = vmul.f32 %v236_v41, %v236_v41 }
  0xed   :  { %v241_v46 = vsel %vm58_vm0, %v237_v42, 0.0  ;;  %v242_v47 = vsel %vm58_vm0, %v238_v43, 0.0  ;;  %v244_v49 = vsel %vm58_vm0, %v239_v44, 0.0  ;;  %v246_v51 = vsel %vm58_vm0, %v240_v45, 0.0 }
  0xee   :  { %v243_v48 = vadd.f32 %v242_v47, %v241_v46 }
  0xf0   :  { %v245_v50 = vadd.f32 %v244_v49, %v243_v48 }
  0xf2   :  { %v247_v52 = vadd.f32 %v246_v51, %v245_v50 }
  0xf4   :  { %v248_v53 = vrot.slane %v247_v52, 4 }
  0xf6   :  { %v249_v54 = vadd.f32 %v248_v53, %v247_v52 }
  0xf8   :  { %v250_v55 = vrot.slane %v249_v54, 2 }
  0xfa   :  { %v251_v56 = vadd.f32 %v250_v55, %v249_v54 }
  0xfc   :  { %v252_v57 = vrot.slane %v251_v56, 1 }
  0xfe   :  { %v253_v58 = vadd.f32 %v252_v57, %v251_v56 }
 0x100   :  { %v255_v59 = vsel %vm254_vm2, %v228_v36, %v253_v58 }
 0x101   :  { %257 = vst.msk [vmem:[%s408_s5] sm:$0x3] %vm256_vm3, %v255_v59 }

</bundles_post_ra>
